<compile_context>
chip_gen: v7x
topology: tpu7x:2x2x1
jax: 0.10.0
libtpu: 0.0.40
codegen_flags: <defaults>
</compile_context>

<pallas_src>
import numpy as np

import jax
import jax.numpy as jnp
from jax.experimental import pallas as pl
from jax.experimental.pallas import tpu as pltpu


def _round_up(x, m):
    return ((x + m - 1) // m) * m


# ----------------------------------------------------------------------------
# Fused Pallas kernel: conv1+relu, conv2+relu, conv3+relu, fc1+relu, fc2
# One grid step == one sample.  All weight refs are VMEM-resident.
# ----------------------------------------------------------------------------
def _dqn_fused_kernel(x_ref,
                      s1_ref, m1_ref, b1_ref,
                      s2_ref, m2_ref, b2_ref,
                      s3_ref, m3_ref, b3_ref,
                      w4_ref, b4_ref, w5_ref, b5_ref,
                      o_ref):
    def conv_layer(a, s_ref, m_ref, b_ref):
        # a: (H, W*Cin) bf16.  s_ref: (KH, OH, H) 0/1 row selectors.
        # m_ref: (KH, W*Cin, OW*OC) width-Toeplitz weights.  b_ref: (1, OW*OC).
        kh = s_ref.shape[0]
        oh = s_ref.shape[1]
        n_out = m_ref.shape[2]
        acc = jnp.zeros((oh, n_out), jnp.float32)
        for i in range(kh):                       # static unroll over kernel rows
            rows = jnp.dot(s_ref[i], a,
                           preferred_element_type=jnp.float32)
            rows = rows.astype(jnp.bfloat16)       # exact: 0/1 selection
            acc = acc + jnp.dot(rows, m_ref[i],
                                preferred_element_type=jnp.float32)
        return jnp.maximum(acc + b_ref[...], 0.0).astype(jnp.bfloat16)

    a = x_ref[0]                                   # (H, W*C) bf16
    a = conv_layer(a, s1_ref, m1_ref, b1_ref)      # (OH1, OW1*32)
    a = conv_layer(a, s2_ref, m2_ref, b2_ref)      # (OH2, OW2*64)
    a = conv_layer(a, s3_ref, m3_ref, b3_ref)      # (conv_h, conv_w*64)

    # fc1 (+ReLU): flatten (h, w, c) without any in-kernel reshape by summing
    # per-row matmuls against the row-partitioned fc1 weight.
    conv_h = w4_ref.shape[0]
    hidden = w4_ref.shape[2]
    acc = jnp.zeros((1, hidden), jnp.float32)
    for r in range(conv_h):
        acc = acc + jnp.dot(a[r:r + 1, :], w4_ref[r],
                            preferred_element_type=jnp.float32)
    h = jnp.maximum(acc + b4_ref[...], 0.0).astype(jnp.bfloat16)

    # fc2 head (output padded to a lane-dense 128; padded cols are zero)
    q = jnp.dot(h, w5_ref[...], preferred_element_type=jnp.float32) + b5_ref[...]
    o_ref[0] = q


def _resident_spec(arr):
    zeros = (0,) * arr.ndim
    return pl.BlockSpec(arr.shape, lambda b, _z=zeros: _z)


def dqn_forward(prep, x, *, num_actions):
    """x: (N, C, H, W) float32 -> (N, num_actions) float32."""
    n, c, h, w = x.shape
    # Single input layout change: NCHW -> (N, H, W*C), bf16 for the MXU.
    xh = jnp.transpose(x, (0, 2, 3, 1)).reshape(n, h, w * c).astype(jnp.bfloat16)

    weights = (prep["s1"], prep["m1"], prep["b1"],
               prep["s2"], prep["m2"], prep["b2"],
               prep["s3"], prep["m3"], prep["b3"],
               prep["w4"], prep["b4"], prep["w5"], prep["b5"])
    n_pad = prep["w5"].shape[1]

    in_specs = [pl.BlockSpec((1, h, w * c), lambda b: (b, 0, 0))]
    in_specs += [_resident_spec(arr) for arr in weights]

    out = pl.pallas_call(
        _dqn_fused_kernel,
        out_shape=jax.ShapeDtypeStruct((n, 1, n_pad), jnp.float32),
        grid=(n,),
        in_specs=in_specs,
        out_specs=pl.BlockSpec((1, 1, n_pad), lambda b: (b, 0, 0)),
        compiler_params=pltpu.CompilerParams(
            dimension_semantics=("parallel",)),   # v7x: one sample per TC
    )(xh, *weights)

    return out.reshape(n, n_pad)[:, :num_actions]


# ----------------------------------------------------------------------------
# Parameters: PyTorch-layout init (deterministic), then one-time kernel layout
# ----------------------------------------------------------------------------
def dqn_init(key, input_shape, num_actions):
    c, h, w = input_shape
    conv_h = ((h - 8) // 4 + 1 - 4) // 2 + 1 - 2
    conv_w = ((w - 8) // 4 + 1 - 4) // 2 + 1 - 2
    feat = conv_h * conv_w * 64

    def uni(k, shape, fan_in):
        bound = 1.0 / jnp.sqrt(jnp.float32(fan_in))
        return jax.random.uniform(k, shape, jnp.float32, -bound, bound)

    ks = jax.random.split(key, 10)
    return {
        "conv1_w": uni(ks[0], (32, c, 8, 8), c * 8 * 8),
        "conv1_b": uni(ks[1], (32,), c * 8 * 8),
        "conv2_w": uni(ks[2], (64, 32, 4, 4), 32 * 4 * 4),
        "conv2_b": uni(ks[3], (64,), 32 * 4 * 4),
        "conv3_w": uni(ks[4], (64, 64, 3, 3), 64 * 3 * 3),
        "conv3_b": uni(ks[5], (64,), 64 * 3 * 3),
        "fc1_w": uni(ks[6], (512, feat), feat),
        "fc1_b": uni(ks[7], (512,), feat),
        "fc2_w": uni(ks[8], (num_actions, 512), 512),
        "fc2_b": uni(ks[9], (num_actions,), 512),
    }


def _conv_toeplitz(w_torch, b_torch, h_in, w_in, stride):
    """(OC, Cin, KH, KW) torch conv -> row-selectors S, width-Toeplitz M, bias."""
    w_np = np.asarray(w_torch, dtype=np.float32)
    b_np = np.asarray(b_torch, dtype=np.float32)
    oc, cin, kh, kw = w_np.shape
    oh = (h_in - kh) // stride + 1
    ow = (w_in - kw) // stride + 1

    s = np.zeros((kh, oh, h_in), np.float32)
    for i in range(kh):
        for r in range(oh):
            s[i, r, r * stride + i] = 1.0

    m = np.zeros((kh, w_in * cin, ow * oc), np.float32)
    for i in range(kh):
        for j in range(kw):
            blk = w_np[:, :, i, j].T                      # (Cin, OC)
            for q in range(ow):
                col = q * stride + j
                m[i, col * cin:(col + 1) * cin, q * oc:(q + 1) * oc] = blk

    bias = np.tile(b_np, ow)[None, :]                     # (1, OW*OC)
    return (jnp.asarray(s, jnp.bfloat16),
            jnp.asarray(m, jnp.bfloat16),
            jnp.asarray(bias, jnp.float32),
            oh, ow)


def prepare_params(params, input_shape):
    """One-time conversion: PyTorch layout -> fused-kernel layout (bf16 weights)."""
    c, h, w = input_shape
    s1, m1, b1, oh1, ow1 = _conv_toeplitz(params["conv1_w"], params["conv1_b"], h, w, 4)
    s2, m2, b2, oh2, ow2 = _conv_toeplitz(params["conv2_w"], params["conv2_b"], oh1, ow1, 2)
    s3, m3, b3, oh3, ow3 = _conv_toeplitz(params["conv3_w"], params["conv3_b"], oh2, ow2, 1)

    # torch fc1 columns are (c, h, w)-ordered; our activation rows are h with
    # (w, c)-ordered columns -> repartition fc1 weight per conv_h row.
    fc1_w = np.asarray(params["fc1_w"], np.float32)        # (512, 64*oh3*ow3)
    hidden = fc1_w.shape[0]
    c3 = params["conv3_w"].shape[0]
    w4 = (fc1_w.reshape(hidden, c3, oh3, ow3)
          .transpose(2, 3, 1, 0)
          .reshape(oh3, ow3 * c3, hidden))
    b4 = np.asarray(params["fc1_b"], np.float32)[None, :]

    fc2_w = np.asarray(params["fc2_w"], np.float32)        # (A, 512)
    num_actions = fc2_w.shape[0]
    n_pad = _round_up(num_actions, 128)                    # lane-dense head output
    w5 = np.zeros((hidden, n_pad), np.float32)
    w5[:, :num_actions] = fc2_w.T
    b5 = np.zeros((1, n_pad), np.float32)
    b5[0, :num_actions] = np.asarray(params["fc2_b"], np.float32)

    return {
        "s1": s1, "m1": m1, "b1": b1,
        "s2": s2, "m2": m2, "b2": b2,
        "s3": s3, "m3": m3, "b3": b3,
        "w4": jnp.asarray(w4, jnp.bfloat16), "b4": jnp.asarray(b4, jnp.float32),
        "w5": jnp.asarray(w5, jnp.bfloat16), "b5": jnp.asarray(b5, jnp.float32),
    }


# ----------------------------------------------------------------------------
# Pure-JAX reference (f32 compute, bf16-rounded weights/inputs) for validation
# ----------------------------------------------------------------------------
def dqn_reference(params, x):
    hi = jax.lax.Precision.HIGHEST

    def q16(a):
        return a.astype(jnp.bfloat16).astype(jnp.float32)

    def conv(a, w, b, stride):
        y = jax.lax.conv_general_dilated(
            a, q16(w), (stride, stride), "VALID",
            dimension_numbers=("NCHW", "OIHW", "NCHW"), precision=hi)
        return jax.nn.relu(y + b.reshape(1, -1, 1, 1))

    a = q16(x)
    a = conv(a, params["conv1_w"], params["conv1_b"], 4)
    a = conv(a, params["conv2_w"], params["conv2_b"], 2)
    a = conv(a, params["conv3_w"], params["conv3_b"], 1)
    a = a.reshape(a.shape[0], -1)
    hdn = jax.nn.relu(jnp.dot(a, q16(params["fc1_w"]).T, precision=hi) + params["fc1_b"])
    return jnp.dot(hdn, q16(params["fc2_w"]).T, precision=hi) + params["fc2_b"]


if __name__ == "__main__":
    # Smallest spatial size the conv stack supports: H = W = 36
    # conv1 -> 8x8, conv2 -> 3x3, conv3 -> 1x1, fc1 in-features = 64.
    batch = 2
    input_shape = (4, 36, 36)
    num_actions = 4

    key = jax.random.PRNGKey(0)
    k_params, k_x = jax.random.split(key)
    torch_layout_params = dqn_init(k_params, input_shape, num_actions)
    params = prepare_params(torch_layout_params, input_shape)
    x = jax.random.normal(k_x, (batch,) + input_shape, dtype=jnp.float32)

    fwd = jax.jit(dqn_forward, static_argnames="num_actions")
    q_values = fwd(params, x, num_actions=num_actions)
    jax.block_until_ready(q_values)

    assert q_values.shape == (batch, num_actions), q_values.shape
    assert bool(jnp.all(jnp.isfinite(q_values)))

    q_ref = dqn_reference(torch_layout_params, x)
    max_err = float(jnp.max(jnp.abs(q_values - q_ref)))
    assert max_err < 2e-2, f"max abs error vs reference: {max_err}"

    print("KERNEL_OK")
</pallas_src>

<mosaic_0001>
module attributes {stable_mosaic.version = 11 : i64} {
  func.func @_dqn_fused_kernel(%arg0: i32, %arg1: memref<1x36x144xbf16, #tpu.memory_space<vmem>>, %arg2: memref<8x8x36xbf16, #tpu.memory_space<vmem>>, %arg3: memref<8x144x256xbf16, #tpu.memory_space<vmem>>, %arg4: memref<1x256xf32, #tpu.memory_space<vmem>>, %arg5: memref<4x3x8xbf16, #tpu.memory_space<vmem>>, %arg6: memref<4x256x192xbf16, #tpu.memory_space<vmem>>, %arg7: memref<1x192xf32, #tpu.memory_space<vmem>>, %arg8: memref<3x1x3xbf16, #tpu.memory_space<vmem>>, %arg9: memref<3x192x64xbf16, #tpu.memory_space<vmem>>, %arg10: memref<1x64xf32, #tpu.memory_space<vmem>>, %arg11: memref<1x64x512xbf16, #tpu.memory_space<vmem>>, %arg12: memref<1x512xf32, #tpu.memory_space<vmem>>, %arg13: memref<512x128xbf16, #tpu.memory_space<vmem>>, %arg14: memref<1x128xf32, #tpu.memory_space<vmem>>, %arg15: memref<1x1x128xf32, #tpu.memory_space<vmem>>) attributes {dimension_semantics = [#tpu.dimension_semantics<parallel>], iteration_bounds = array<i64: 2>, scalar_prefetch = 0 : i64, scratch_operands = 0 : i64, tpu.core_type = #tpu.core_type<tc>, window_params = [{transform_indices = @transform_0, window_bounds = array<i64: 1, 36, 144>}, {pipeline_mode = #tpu.pipeline_mode<synchronous>, transform_indices = @transform_1, window_bounds = array<i64: 8, 8, 36>}, {pipeline_mode = #tpu.pipeline_mode<synchronous>, transform_indices = @transform_2, window_bounds = array<i64: 8, 144, 256>}, {pipeline_mode = #tpu.pipeline_mode<synchronous>, transform_indices = @transform_3, window_bounds = array<i64: 1, 256>}, {pipeline_mode = #tpu.pipeline_mode<synchronous>, transform_indices = @transform_4, window_bounds = array<i64: 4, 3, 8>}, {pipeline_mode = #tpu.pipeline_mode<synchronous>, transform_indices = @transform_5, window_bounds = array<i64: 4, 256, 192>}, {pipeline_mode = #tpu.pipeline_mode<synchronous>, transform_indices = @transform_6, window_bounds = array<i64: 1, 192>}, {pipeline_mode = #tpu.pipeline_mode<synchronous>, transform_indices = @transform_7, window_bounds = array<i64: 3, 1, 3>}, {pipeline_mode = #tpu.pipeline_mode<synchronous>, transform_indices = @transform_8, window_bounds = array<i64: 3, 192, 64>}, {pipeline_mode = #tpu.pipeline_mode<synchronous>, transform_indices = @transform_9, window_bounds = array<i64: 1, 64>}, {pipeline_mode = #tpu.pipeline_mode<synchronous>, transform_indices = @transform_10, window_bounds = array<i64: 1, 64, 512>}, {pipeline_mode = #tpu.pipeline_mode<synchronous>, transform_indices = @transform_11, window_bounds = array<i64: 1, 512>}, {pipeline_mode = #tpu.pipeline_mode<synchronous>, transform_indices = @transform_12, window_bounds = array<i64: 512, 128>}, {pipeline_mode = #tpu.pipeline_mode<synchronous>, transform_indices = @transform_13, window_bounds = array<i64: 1, 128>}, {transform_indices = @transform_14, window_bounds = array<i64: 1, 1, 128>}]} {
    %c0 = arith.constant 0 : index
    %c0_0 = arith.constant 0 : index
    %c0_1 = arith.constant 0 : index
    %0 = vector.load %arg1[%c0, %c0_0, %c0_1] : memref<1x36x144xbf16, #tpu.memory_space<vmem>>, vector<1x36x144xbf16>
    %1 = vector.shape_cast %0 : vector<1x36x144xbf16> to vector<36x144xbf16>
    %cst = arith.constant 0.000000e+00 : f32
    %2 = vector.broadcast %cst : f32 to vector<8x256xf32>
    %c0_2 = arith.constant 0 : index
    %c0_3 = arith.constant 0 : index
    %c0_4 = arith.constant 0 : index
    %3 = vector.load %arg2[%c0_2, %c0_3, %c0_4] : memref<8x8x36xbf16, #tpu.memory_space<vmem>>, vector<1x8x36xbf16>
    %4 = vector.shape_cast %3 : vector<1x8x36xbf16> to vector<8x36xbf16>
    %cst_5 = arith.constant dense<0.000000e+00> : vector<8x144xf32>
    %5 = tpu.matmul %4, %1, %cst_5 {dimension_numbers = #tpu.dot_dimension_numbers<[1], [0], [0], [1], [0, 0, 1, 1], [], []>} : vector<8x36xbf16>, vector<36x144xbf16>, vector<8x144xf32> -> vector<8x144xf32>
    %6 = arith.truncf %5 : vector<8x144xf32> to vector<8x144xbf16>
    %c0_6 = arith.constant 0 : index
    %c0_7 = arith.constant 0 : index
    %c0_8 = arith.constant 0 : index
    %7 = vector.load %arg3[%c0_6, %c0_7, %c0_8] : memref<8x144x256xbf16, #tpu.memory_space<vmem>>, vector<1x144x256xbf16>
    %8 = vector.shape_cast %7 : vector<1x144x256xbf16> to vector<144x256xbf16>
    %cst_9 = arith.constant dense<0.000000e+00> : vector<8x256xf32>
    %9 = tpu.matmul %6, %8, %cst_9 {dimension_numbers = #tpu.dot_dimension_numbers<[1], [0], [0], [1], [0, 0, 1, 1], [], []>} : vector<8x144xbf16>, vector<144x256xbf16>, vector<8x256xf32> -> vector<8x256xf32>
    %10 = arith.addf %2, %9 : vector<8x256xf32>
    %c1 = arith.constant 1 : index
    %c0_10 = arith.constant 0 : index
    %c0_11 = arith.constant 0 : index
    %11 = vector.load %arg2[%c1, %c0_10, %c0_11] : memref<8x8x36xbf16, #tpu.memory_space<vmem>>, vector<1x8x36xbf16>
    %12 = vector.shape_cast %11 : vector<1x8x36xbf16> to vector<8x36xbf16>
    %cst_12 = arith.constant dense<0.000000e+00> : vector<8x144xf32>
    %13 = tpu.matmul %12, %1, %cst_12 {dimension_numbers = #tpu.dot_dimension_numbers<[1], [0], [0], [1], [0, 0, 1, 1], [], []>} : vector<8x36xbf16>, vector<36x144xbf16>, vector<8x144xf32> -> vector<8x144xf32>
    %14 = arith.truncf %13 : vector<8x144xf32> to vector<8x144xbf16>
    %c1_13 = arith.constant 1 : index
    %c0_14 = arith.constant 0 : index
    %c0_15 = arith.constant 0 : index
    %15 = vector.load %arg3[%c1_13, %c0_14, %c0_15] : memref<8x144x256xbf16, #tpu.memory_space<vmem>>, vector<1x144x256xbf16>
    %16 = vector.shape_cast %15 : vector<1x144x256xbf16> to vector<144x256xbf16>
    %cst_16 = arith.constant dense<0.000000e+00> : vector<8x256xf32>
    %17 = tpu.matmul %14, %16, %cst_16 {dimension_numbers = #tpu.dot_dimension_numbers<[1], [0], [0], [1], [0, 0, 1, 1], [], []>} : vector<8x144xbf16>, vector<144x256xbf16>, vector<8x256xf32> -> vector<8x256xf32>
    %18 = arith.addf %10, %17 : vector<8x256xf32>
    %c2 = arith.constant 2 : index
    %c0_17 = arith.constant 0 : index
    %c0_18 = arith.constant 0 : index
    %19 = vector.load %arg2[%c2, %c0_17, %c0_18] : memref<8x8x36xbf16, #tpu.memory_space<vmem>>, vector<1x8x36xbf16>
    %20 = vector.shape_cast %19 : vector<1x8x36xbf16> to vector<8x36xbf16>
    %cst_19 = arith.constant dense<0.000000e+00> : vector<8x144xf32>
    %21 = tpu.matmul %20, %1, %cst_19 {dimension_numbers = #tpu.dot_dimension_numbers<[1], [0], [0], [1], [0, 0, 1, 1], [], []>} : vector<8x36xbf16>, vector<36x144xbf16>, vector<8x144xf32> -> vector<8x144xf32>
    %22 = arith.truncf %21 : vector<8x144xf32> to vector<8x144xbf16>
    %c2_20 = arith.constant 2 : index
    %c0_21 = arith.constant 0 : index
    %c0_22 = arith.constant 0 : index
    %23 = vector.load %arg3[%c2_20, %c0_21, %c0_22] : memref<8x144x256xbf16, #tpu.memory_space<vmem>>, vector<1x144x256xbf16>
    %24 = vector.shape_cast %23 : vector<1x144x256xbf16> to vector<144x256xbf16>
    %cst_23 = arith.constant dense<0.000000e+00> : vector<8x256xf32>
    %25 = tpu.matmul %22, %24, %cst_23 {dimension_numbers = #tpu.dot_dimension_numbers<[1], [0], [0], [1], [0, 0, 1, 1], [], []>} : vector<8x144xbf16>, vector<144x256xbf16>, vector<8x256xf32> -> vector<8x256xf32>
    %26 = arith.addf %18, %25 : vector<8x256xf32>
    %c3 = arith.constant 3 : index
    %c0_24 = arith.constant 0 : index
    %c0_25 = arith.constant 0 : index
    %27 = vector.load %arg2[%c3, %c0_24, %c0_25] : memref<8x8x36xbf16, #tpu.memory_space<vmem>>, vector<1x8x36xbf16>
    %28 = vector.shape_cast %27 : vector<1x8x36xbf16> to vector<8x36xbf16>
    %cst_26 = arith.constant dense<0.000000e+00> : vector<8x144xf32>
    %29 = tpu.matmul %28, %1, %cst_26 {dimension_numbers = #tpu.dot_dimension_numbers<[1], [0], [0], [1], [0, 0, 1, 1], [], []>} : vector<8x36xbf16>, vector<36x144xbf16>, vector<8x144xf32> -> vector<8x144xf32>
    %30 = arith.truncf %29 : vector<8x144xf32> to vector<8x144xbf16>
    %c3_27 = arith.constant 3 : index
    %c0_28 = arith.constant 0 : index
    %c0_29 = arith.constant 0 : index
    %31 = vector.load %arg3[%c3_27, %c0_28, %c0_29] : memref<8x144x256xbf16, #tpu.memory_space<vmem>>, vector<1x144x256xbf16>
    %32 = vector.shape_cast %31 : vector<1x144x256xbf16> to vector<144x256xbf16>
    %cst_30 = arith.constant dense<0.000000e+00> : vector<8x256xf32>
    %33 = tpu.matmul %30, %32, %cst_30 {dimension_numbers = #tpu.dot_dimension_numbers<[1], [0], [0], [1], [0, 0, 1, 1], [], []>} : vector<8x144xbf16>, vector<144x256xbf16>, vector<8x256xf32> -> vector<8x256xf32>
    %34 = arith.addf %26, %33 : vector<8x256xf32>
    %c4 = arith.constant 4 : index
    %c0_31 = arith.constant 0 : index
    %c0_32 = arith.constant 0 : index
    %35 = vector.load %arg2[%c4, %c0_31, %c0_32] : memref<8x8x36xbf16, #tpu.memory_space<vmem>>, vector<1x8x36xbf16>
    %36 = vector.shape_cast %35 : vector<1x8x36xbf16> to vector<8x36xbf16>
    %cst_33 = arith.constant dense<0.000000e+00> : vector<8x144xf32>
    %37 = tpu.matmul %36, %1, %cst_33 {dimension_numbers = #tpu.dot_dimension_numbers<[1], [0], [0], [1], [0, 0, 1, 1], [], []>} : vector<8x36xbf16>, vector<36x144xbf16>, vector<8x144xf32> -> vector<8x144xf32>
    %38 = arith.truncf %37 : vector<8x144xf32> to vector<8x144xbf16>
    %c4_34 = arith.constant 4 : index
    %c0_35 = arith.constant 0 : index
    %c0_36 = arith.constant 0 : index
    %39 = vector.load %arg3[%c4_34, %c0_35, %c0_36] : memref<8x144x256xbf16, #tpu.memory_space<vmem>>, vector<1x144x256xbf16>
    %40 = vector.shape_cast %39 : vector<1x144x256xbf16> to vector<144x256xbf16>
    %cst_37 = arith.constant dense<0.000000e+00> : vector<8x256xf32>
    %41 = tpu.matmul %38, %40, %cst_37 {dimension_numbers = #tpu.dot_dimension_numbers<[1], [0], [0], [1], [0, 0, 1, 1], [], []>} : vector<8x144xbf16>, vector<144x256xbf16>, vector<8x256xf32> -> vector<8x256xf32>
    %42 = arith.addf %34, %41 : vector<8x256xf32>
    %c5 = arith.constant 5 : index
    %c0_38 = arith.constant 0 : index
    %c0_39 = arith.constant 0 : index
    %43 = vector.load %arg2[%c5, %c0_38, %c0_39] : memref<8x8x36xbf16, #tpu.memory_space<vmem>>, vector<1x8x36xbf16>
    %44 = vector.shape_cast %43 : vector<1x8x36xbf16> to vector<8x36xbf16>
    %cst_40 = arith.constant dense<0.000000e+00> : vector<8x144xf32>
    %45 = tpu.matmul %44, %1, %cst_40 {dimension_numbers = #tpu.dot_dimension_numbers<[1], [0], [0], [1], [0, 0, 1, 1], [], []>} : vector<8x36xbf16>, vector<36x144xbf16>, vector<8x144xf32> -> vector<8x144xf32>
    %46 = arith.truncf %45 : vector<8x144xf32> to vector<8x144xbf16>
    %c5_41 = arith.constant 5 : index
    %c0_42 = arith.constant 0 : index
    %c0_43 = arith.constant 0 : index
    %47 = vector.load %arg3[%c5_41, %c0_42, %c0_43] : memref<8x144x256xbf16, #tpu.memory_space<vmem>>, vector<1x144x256xbf16>
    %48 = vector.shape_cast %47 : vector<1x144x256xbf16> to vector<144x256xbf16>
    %cst_44 = arith.constant dense<0.000000e+00> : vector<8x256xf32>
    %49 = tpu.matmul %46, %48, %cst_44 {dimension_numbers = #tpu.dot_dimension_numbers<[1], [0], [0], [1], [0, 0, 1, 1], [], []>} : vector<8x144xbf16>, vector<144x256xbf16>, vector<8x256xf32> -> vector<8x256xf32>
    %50 = arith.addf %42, %49 : vector<8x256xf32>
    %c6 = arith.constant 6 : index
    %c0_45 = arith.constant 0 : index
    %c0_46 = arith.constant 0 : index
    %51 = vector.load %arg2[%c6, %c0_45, %c0_46] : memref<8x8x36xbf16, #tpu.memory_space<vmem>>, vector<1x8x36xbf16>
    %52 = vector.shape_cast %51 : vector<1x8x36xbf16> to vector<8x36xbf16>
    %cst_47 = arith.constant dense<0.000000e+00> : vector<8x144xf32>
    %53 = tpu.matmul %52, %1, %cst_47 {dimension_numbers = #tpu.dot_dimension_numbers<[1], [0], [0], [1], [0, 0, 1, 1], [], []>} : vector<8x36xbf16>, vector<36x144xbf16>, vector<8x144xf32> -> vector<8x144xf32>
    %54 = arith.truncf %53 : vector<8x144xf32> to vector<8x144xbf16>
    %c6_48 = arith.constant 6 : index
    %c0_49 = arith.constant 0 : index
    %c0_50 = arith.constant 0 : index
    %55 = vector.load %arg3[%c6_48, %c0_49, %c0_50] : memref<8x144x256xbf16, #tpu.memory_space<vmem>>, vector<1x144x256xbf16>
    %56 = vector.shape_cast %55 : vector<1x144x256xbf16> to vector<144x256xbf16>
    %cst_51 = arith.constant dense<0.000000e+00> : vector<8x256xf32>
    %57 = tpu.matmul %54, %56, %cst_51 {dimension_numbers = #tpu.dot_dimension_numbers<[1], [0], [0], [1], [0, 0, 1, 1], [], []>} : vector<8x144xbf16>, vector<144x256xbf16>, vector<8x256xf32> -> vector<8x256xf32>
    %58 = arith.addf %50, %57 : vector<8x256xf32>
    %c7 = arith.constant 7 : index
    %c0_52 = arith.constant 0 : index
    %c0_53 = arith.constant 0 : index
    %59 = vector.load %arg2[%c7, %c0_52, %c0_53] : memref<8x8x36xbf16, #tpu.memory_space<vmem>>, vector<1x8x36xbf16>
    %60 = vector.shape_cast %59 : vector<1x8x36xbf16> to vector<8x36xbf16>
    %cst_54 = arith.constant dense<0.000000e+00> : vector<8x144xf32>
    %61 = tpu.matmul %60, %1, %cst_54 {dimension_numbers = #tpu.dot_dimension_numbers<[1], [0], [0], [1], [0, 0, 1, 1], [], []>} : vector<8x36xbf16>, vector<36x144xbf16>, vector<8x144xf32> -> vector<8x144xf32>
    %62 = arith.truncf %61 : vector<8x144xf32> to vector<8x144xbf16>
    %c7_55 = arith.constant 7 : index
    %c0_56 = arith.constant 0 : index
    %c0_57 = arith.constant 0 : index
    %63 = vector.load %arg3[%c7_55, %c0_56, %c0_57] : memref<8x144x256xbf16, #tpu.memory_space<vmem>>, vector<1x144x256xbf16>
    %64 = vector.shape_cast %63 : vector<1x144x256xbf16> to vector<144x256xbf16>
    %cst_58 = arith.constant dense<0.000000e+00> : vector<8x256xf32>
    %65 = tpu.matmul %62, %64, %cst_58 {dimension_numbers = #tpu.dot_dimension_numbers<[1], [0], [0], [1], [0, 0, 1, 1], [], []>} : vector<8x144xbf16>, vector<144x256xbf16>, vector<8x256xf32> -> vector<8x256xf32>
    %66 = arith.addf %58, %65 : vector<8x256xf32>
    %c0_59 = arith.constant 0 : index
    %c0_60 = arith.constant 0 : index
    %67 = vector.load %arg4[%c0_59, %c0_60] : memref<1x256xf32, #tpu.memory_space<vmem>>, vector<1x256xf32>
    %68 = vector.broadcast %67 : vector<1x256xf32> to vector<8x256xf32>
    %69 = arith.addf %66, %68 : vector<8x256xf32>
    %cst_61 = arith.constant 0.000000e+00 : f32
    %70 = vector.broadcast %cst_61 : f32 to vector<8x256xf32>
    %71 = arith.maximumf %69, %70 : vector<8x256xf32>
    %72 = arith.truncf %71 : vector<8x256xf32> to vector<8x256xbf16>
    %cst_62 = arith.constant 0.000000e+00 : f32
    %73 = vector.broadcast %cst_62 : f32 to vector<3x192xf32>
    %c0_63 = arith.constant 0 : index
    %c0_64 = arith.constant 0 : index
    %c0_65 = arith.constant 0 : index
    %74 = vector.load %arg5[%c0_63, %c0_64, %c0_65] : memref<4x3x8xbf16, #tpu.memory_space<vmem>>, vector<1x3x8xbf16>
    %75 = vector.shape_cast %74 : vector<1x3x8xbf16> to vector<3x8xbf16>
    %cst_66 = arith.constant dense<0.000000e+00> : vector<3x256xf32>
    %76 = tpu.matmul %75, %72, %cst_66 {dimension_numbers = #tpu.dot_dimension_numbers<[1], [0], [0], [1], [0, 0, 1, 1], [], []>} : vector<3x8xbf16>, vector<8x256xbf16>, vector<3x256xf32> -> vector<3x256xf32>
    %77 = arith.truncf %76 : vector<3x256xf32> to vector<3x256xbf16>
    %c0_67 = arith.constant 0 : index
    %c0_68 = arith.constant 0 : index
    %c0_69 = arith.constant 0 : index
    %78 = vector.load %arg6[%c0_67, %c0_68, %c0_69] : memref<4x256x192xbf16, #tpu.memory_space<vmem>>, vector<1x256x192xbf16>
    %79 = vector.shape_cast %78 : vector<1x256x192xbf16> to vector<256x192xbf16>
    %cst_70 = arith.constant dense<0.000000e+00> : vector<3x192xf32>
    %80 = tpu.matmul %77, %79, %cst_70 {dimension_numbers = #tpu.dot_dimension_numbers<[1], [0], [0], [1], [0, 0, 1, 1], [], []>} : vector<3x256xbf16>, vector<256x192xbf16>, vector<3x192xf32> -> vector<3x192xf32>
    %81 = arith.addf %73, %80 : vector<3x192xf32>
    %c1_71 = arith.constant 1 : index
    %c0_72 = arith.constant 0 : index
    %c0_73 = arith.constant 0 : index
    %82 = vector.load %arg5[%c1_71, %c0_72, %c0_73] : memref<4x3x8xbf16, #tpu.memory_space<vmem>>, vector<1x3x8xbf16>
    %83 = vector.shape_cast %82 : vector<1x3x8xbf16> to vector<3x8xbf16>
    %cst_74 = arith.constant dense<0.000000e+00> : vector<3x256xf32>
    %84 = tpu.matmul %83, %72, %cst_74 {dimension_numbers = #tpu.dot_dimension_numbers<[1], [0], [0], [1], [0, 0, 1, 1], [], []>} : vector<3x8xbf16>, vector<8x256xbf16>, vector<3x256xf32> -> vector<3x256xf32>
    %85 = arith.truncf %84 : vector<3x256xf32> to vector<3x256xbf16>
    %c1_75 = arith.constant 1 : index
    %c0_76 = arith.constant 0 : index
    %c0_77 = arith.constant 0 : index
    %86 = vector.load %arg6[%c1_75, %c0_76, %c0_77] : memref<4x256x192xbf16, #tpu.memory_space<vmem>>, vector<1x256x192xbf16>
    %87 = vector.shape_cast %86 : vector<1x256x192xbf16> to vector<256x192xbf16>
    %cst_78 = arith.constant dense<0.000000e+00> : vector<3x192xf32>
    %88 = tpu.matmul %85, %87, %cst_78 {dimension_numbers = #tpu.dot_dimension_numbers<[1], [0], [0], [1], [0, 0, 1, 1], [], []>} : vector<3x256xbf16>, vector<256x192xbf16>, vector<3x192xf32> -> vector<3x192xf32>
    %89 = arith.addf %81, %88 : vector<3x192xf32>
    %c2_79 = arith.constant 2 : index
    %c0_80 = arith.constant 0 : index
    %c0_81 = arith.constant 0 : index
    %90 = vector.load %arg5[%c2_79, %c0_80, %c0_81] : memref<4x3x8xbf16, #tpu.memory_space<vmem>>, vector<1x3x8xbf16>
    %91 = vector.shape_cast %90 : vector<1x3x8xbf16> to vector<3x8xbf16>
    %cst_82 = arith.constant dense<0.000000e+00> : vector<3x256xf32>
    %92 = tpu.matmul %91, %72, %cst_82 {dimension_numbers = #tpu.dot_dimension_numbers<[1], [0], [0], [1], [0, 0, 1, 1], [], []>} : vector<3x8xbf16>, vector<8x256xbf16>, vector<3x256xf32> -> vector<3x256xf32>
    %93 = arith.truncf %92 : vector<3x256xf32> to vector<3x256xbf16>
    %c2_83 = arith.constant 2 : index
    %c0_84 = arith.constant 0 : index
    %c0_85 = arith.constant 0 : index
    %94 = vector.load %arg6[%c2_83, %c0_84, %c0_85] : memref<4x256x192xbf16, #tpu.memory_space<vmem>>, vector<1x256x192xbf16>
    %95 = vector.shape_cast %94 : vector<1x256x192xbf16> to vector<256x192xbf16>
    %cst_86 = arith.constant dense<0.000000e+00> : vector<3x192xf32>
    %96 = tpu.matmul %93, %95, %cst_86 {dimension_numbers = #tpu.dot_dimension_numbers<[1], [0], [0], [1], [0, 0, 1, 1], [], []>} : vector<3x256xbf16>, vector<256x192xbf16>, vector<3x192xf32> -> vector<3x192xf32>
    %97 = arith.addf %89, %96 : vector<3x192xf32>
    %c3_87 = arith.constant 3 : index
    %c0_88 = arith.constant 0 : index
    %c0_89 = arith.constant 0 : index
    %98 = vector.load %arg5[%c3_87, %c0_88, %c0_89] : memref<4x3x8xbf16, #tpu.memory_space<vmem>>, vector<1x3x8xbf16>
    %99 = vector.shape_cast %98 : vector<1x3x8xbf16> to vector<3x8xbf16>
    %cst_90 = arith.constant dense<0.000000e+00> : vector<3x256xf32>
    %100 = tpu.matmul %99, %72, %cst_90 {dimension_numbers = #tpu.dot_dimension_numbers<[1], [0], [0], [1], [0, 0, 1, 1], [], []>} : vector<3x8xbf16>, vector<8x256xbf16>, vector<3x256xf32> -> vector<3x256xf32>
    %101 = arith.truncf %100 : vector<3x256xf32> to vector<3x256xbf16>
    %c3_91 = arith.constant 3 : index
    %c0_92 = arith.constant 0 : index
    %c0_93 = arith.constant 0 : index
    %102 = vector.load %arg6[%c3_91, %c0_92, %c0_93] : memref<4x256x192xbf16, #tpu.memory_space<vmem>>, vector<1x256x192xbf16>
    %103 = vector.shape_cast %102 : vector<1x256x192xbf16> to vector<256x192xbf16>
    %cst_94 = arith.constant dense<0.000000e+00> : vector<3x192xf32>
    %104 = tpu.matmul %101, %103, %cst_94 {dimension_numbers = #tpu.dot_dimension_numbers<[1], [0], [0], [1], [0, 0, 1, 1], [], []>} : vector<3x256xbf16>, vector<256x192xbf16>, vector<3x192xf32> -> vector<3x192xf32>
    %105 = arith.addf %97, %104 : vector<3x192xf32>
    %c0_95 = arith.constant 0 : index
    %c0_96 = arith.constant 0 : index
    %106 = vector.load %arg7[%c0_95, %c0_96] : memref<1x192xf32, #tpu.memory_space<vmem>>, vector<1x192xf32>
    %107 = vector.broadcast %106 : vector<1x192xf32> to vector<3x192xf32>
    %108 = arith.addf %105, %107 : vector<3x192xf32>
    %cst_97 = arith.constant 0.000000e+00 : f32
    %109 = vector.broadcast %cst_97 : f32 to vector<3x192xf32>
    %110 = arith.maximumf %108, %109 : vector<3x192xf32>
    %111 = arith.truncf %110 : vector<3x192xf32> to vector<3x192xbf16>
    %cst_98 = arith.constant 0.000000e+00 : f32
    %112 = vector.broadcast %cst_98 : f32 to vector<1x64xf32>
    %c0_99 = arith.constant 0 : index
    %c0_100 = arith.constant 0 : index
    %c0_101 = arith.constant 0 : index
    %113 = vector.load %arg8[%c0_99, %c0_100, %c0_101] : memref<3x1x3xbf16, #tpu.memory_space<vmem>>, vector<1x1x3xbf16>
    %114 = vector.shape_cast %113 : vector<1x1x3xbf16> to vector<1x3xbf16>
    %cst_102 = arith.constant dense<0.000000e+00> : vector<1x192xf32>
    %115 = tpu.matmul %114, %111, %cst_102 {dimension_numbers = #tpu.dot_dimension_numbers<[1], [0], [0], [1], [0, 0, 1, 1], [], []>} : vector<1x3xbf16>, vector<3x192xbf16>, vector<1x192xf32> -> vector<1x192xf32>
    %116 = arith.truncf %115 : vector<1x192xf32> to vector<1x192xbf16>
    %c0_103 = arith.constant 0 : index
    %c0_104 = arith.constant 0 : index
    %c0_105 = arith.constant 0 : index
    %117 = vector.load %arg9[%c0_103, %c0_104, %c0_105] : memref<3x192x64xbf16, #tpu.memory_space<vmem>>, vector<1x192x64xbf16>
    %118 = vector.shape_cast %117 : vector<1x192x64xbf16> to vector<192x64xbf16>
    %cst_106 = arith.constant dense<0.000000e+00> : vector<1x64xf32>
    %119 = tpu.matmul %116, %118, %cst_106 {dimension_numbers = #tpu.dot_dimension_numbers<[1], [0], [0], [1], [0, 0, 1, 1], [], []>} : vector<1x192xbf16>, vector<192x64xbf16>, vector<1x64xf32> -> vector<1x64xf32>
    %120 = arith.addf %112, %119 : vector<1x64xf32>
    %c1_107 = arith.constant 1 : index
    %c0_108 = arith.constant 0 : index
    %c0_109 = arith.constant 0 : index
    %121 = vector.load %arg8[%c1_107, %c0_108, %c0_109] : memref<3x1x3xbf16, #tpu.memory_space<vmem>>, vector<1x1x3xbf16>
    %122 = vector.shape_cast %121 : vector<1x1x3xbf16> to vector<1x3xbf16>
    %cst_110 = arith.constant dense<0.000000e+00> : vector<1x192xf32>
    %123 = tpu.matmul %122, %111, %cst_110 {dimension_numbers = #tpu.dot_dimension_numbers<[1], [0], [0], [1], [0, 0, 1, 1], [], []>} : vector<1x3xbf16>, vector<3x192xbf16>, vector<1x192xf32> -> vector<1x192xf32>
    %124 = arith.truncf %123 : vector<1x192xf32> to vector<1x192xbf16>
    %c1_111 = arith.constant 1 : index
    %c0_112 = arith.constant 0 : index
    %c0_113 = arith.constant 0 : index
    %125 = vector.load %arg9[%c1_111, %c0_112, %c0_113] : memref<3x192x64xbf16, #tpu.memory_space<vmem>>, vector<1x192x64xbf16>
    %126 = vector.shape_cast %125 : vector<1x192x64xbf16> to vector<192x64xbf16>
    %cst_114 = arith.constant dense<0.000000e+00> : vector<1x64xf32>
    %127 = tpu.matmul %124, %126, %cst_114 {dimension_numbers = #tpu.dot_dimension_numbers<[1], [0], [0], [1], [0, 0, 1, 1], [], []>} : vector<1x192xbf16>, vector<192x64xbf16>, vector<1x64xf32> -> vector<1x64xf32>
    %128 = arith.addf %120, %127 : vector<1x64xf32>
    %c2_115 = arith.constant 2 : index
    %c0_116 = arith.constant 0 : index
    %c0_117 = arith.constant 0 : index
    %129 = vector.load %arg8[%c2_115, %c0_116, %c0_117] : memref<3x1x3xbf16, #tpu.memory_space<vmem>>, vector<1x1x3xbf16>
    %130 = vector.shape_cast %129 : vector<1x1x3xbf16> to vector<1x3xbf16>
    %cst_118 = arith.constant dense<0.000000e+00> : vector<1x192xf32>
    %131 = tpu.matmul %130, %111, %cst_118 {dimension_numbers = #tpu.dot_dimension_numbers<[1], [0], [0], [1], [0, 0, 1, 1], [], []>} : vector<1x3xbf16>, vector<3x192xbf16>, vector<1x192xf32> -> vector<1x192xf32>
    %132 = arith.truncf %131 : vector<1x192xf32> to vector<1x192xbf16>
    %c2_119 = arith.constant 2 : index
    %c0_120 = arith.constant 0 : index
    %c0_121 = arith.constant 0 : index
    %133 = vector.load %arg9[%c2_119, %c0_120, %c0_121] : memref<3x192x64xbf16, #tpu.memory_space<vmem>>, vector<1x192x64xbf16>
    %134 = vector.shape_cast %133 : vector<1x192x64xbf16> to vector<192x64xbf16>
    %cst_122 = arith.constant dense<0.000000e+00> : vector<1x64xf32>
    %135 = tpu.matmul %132, %134, %cst_122 {dimension_numbers = #tpu.dot_dimension_numbers<[1], [0], [0], [1], [0, 0, 1, 1], [], []>} : vector<1x192xbf16>, vector<192x64xbf16>, vector<1x64xf32> -> vector<1x64xf32>
    %136 = arith.addf %128, %135 : vector<1x64xf32>
    %c0_123 = arith.constant 0 : index
    %c0_124 = arith.constant 0 : index
    %137 = vector.load %arg10[%c0_123, %c0_124] : memref<1x64xf32, #tpu.memory_space<vmem>>, vector<1x64xf32>
    %138 = arith.addf %136, %137 : vector<1x64xf32>
    %cst_125 = arith.constant 0.000000e+00 : f32
    %139 = vector.broadcast %cst_125 : f32 to vector<1x64xf32>
    %140 = arith.maximumf %138, %139 : vector<1x64xf32>
    %141 = arith.truncf %140 : vector<1x64xf32> to vector<1x64xbf16>
    %cst_126 = arith.constant 0.000000e+00 : f32
    %142 = vector.broadcast %cst_126 : f32 to vector<1x512xf32>
    %c0_127 = arith.constant 0 : index
    %c0_128 = arith.constant 0 : index
    %c0_129 = arith.constant 0 : index
    %143 = vector.load %arg11[%c0_127, %c0_128, %c0_129] : memref<1x64x512xbf16, #tpu.memory_space<vmem>>, vector<1x64x512xbf16>
    %144 = vector.shape_cast %143 : vector<1x64x512xbf16> to vector<64x512xbf16>
    %cst_130 = arith.constant dense<0.000000e+00> : vector<1x512xf32>
    %145 = tpu.matmul %141, %144, %cst_130 {dimension_numbers = #tpu.dot_dimension_numbers<[1], [0], [0], [1], [0, 0, 1, 1], [], []>} : vector<1x64xbf16>, vector<64x512xbf16>, vector<1x512xf32> -> vector<1x512xf32>
    %146 = arith.addf %142, %145 : vector<1x512xf32>
    %c0_131 = arith.constant 0 : index
    %c0_132 = arith.constant 0 : index
    %147 = vector.load %arg12[%c0_131, %c0_132] : memref<1x512xf32, #tpu.memory_space<vmem>>, vector<1x512xf32>
    %148 = arith.addf %146, %147 : vector<1x512xf32>
    %cst_133 = arith.constant 0.000000e+00 : f32
    %149 = vector.broadcast %cst_133 : f32 to vector<1x512xf32>
    %150 = arith.maximumf %148, %149 : vector<1x512xf32>
    %151 = arith.truncf %150 : vector<1x512xf32> to vector<1x512xbf16>
    %c0_134 = arith.constant 0 : index
    %c0_135 = arith.constant 0 : index
    %152 = vector.load %arg13[%c0_134, %c0_135] : memref<512x128xbf16, #tpu.memory_space<vmem>>, vector<512x128xbf16>
    %cst_136 = arith.constant dense<0.000000e+00> : vector<1x128xf32>
    %153 = tpu.matmul %151, %152, %cst_136 {dimension_numbers = #tpu.dot_dimension_numbers<[1], [0], [0], [1], [0, 0, 1, 1], [], []>} : vector<1x512xbf16>, vector<512x128xbf16>, vector<1x128xf32> -> vector<1x128xf32>
    %c0_137 = arith.constant 0 : index
    %c0_138 = arith.constant 0 : index
    %154 = vector.load %arg14[%c0_137, %c0_138] : memref<1x128xf32, #tpu.memory_space<vmem>>, vector<1x128xf32>
    %155 = arith.addf %153, %154 : vector<1x128xf32>
    %c0_139 = arith.constant 0 : index
    %c0_140 = arith.constant 0 : index
    %c0_141 = arith.constant 0 : index
    %156 = vector.load %arg15[%c0_139, %c0_140, %c0_141] : memref<1x1x128xf32, #tpu.memory_space<vmem>>, vector<1x1x128xf32>
    %157 = vector.shape_cast %156 : vector<1x1x128xf32> to vector<1x128xf32>
    %158 = vector.shape_cast %155 : vector<1x128xf32> to vector<1x1x128xf32>
    tpu.vector_store %arg15[%c0_139, %c0_140, %c0_141], %158 {strides = array<i32>} : memref<1x1x128xf32, #tpu.memory_space<vmem>>, vector<1x1x128xf32>,
    return
  }
  func.func @transform_0(%arg0: i32) -> (i32, i32, i32) {
    %c0_i32 = arith.constant 0 : i32
    %c0_i32_0 = arith.constant 0 : i32
    %c0_i32_1 = arith.constant 0 : i32
    return %arg0, %c0_i32, %c0_i32_0 : i32, i32, i32
  }
  func.func @transform_1(%arg0: i32) -> (i32, i32, i32) {
    %c0_i32 = arith.constant 0 : i32
    %c0_i32_0 = arith.constant 0 : i32
    %c0_i32_1 = arith.constant 0 : i32
    %c0_i32_2 = arith.constant 0 : i32
    return %c0_i32, %c0_i32_0, %c0_i32_1 : i32, i32, i32
  }
  func.func @transform_2(%arg0: i32) -> (i32, i32, i32) {
    %c0_i32 = arith.constant 0 : i32
    %c0_i32_0 = arith.constant 0 : i32
    %c0_i32_1 = arith.constant 0 : i32
    %c0_i32_2 = arith.constant 0 : i32
    return %c0_i32, %c0_i32_0, %c0_i32_1 : i32, i32, i32
  }
  func.func @transform_3(%arg0: i32) -> (i32, i32) {
    %c0_i32 = arith.constant 0 : i32
    %c0_i32_0 = arith.constant 0 : i32
    %c0_i32_1 = arith.constant 0 : i32
    return %c0_i32, %c0_i32_0 : i32, i32
  }
  func.func @transform_4(%arg0: i32) -> (i32, i32, i32) {
    %c0_i32 = arith.constant 0 : i32
    %c0_i32_0 = arith.constant 0 : i32
    %c0_i32_1 = arith.constant 0 : i32
    %c0_i32_2 = arith.constant 0 : i32
    return %c0_i32, %c0_i32_0, %c0_i32_1 : i32, i32, i32
  }
  func.func @transform_5(%arg0: i32) -> (i32, i32, i32) {
    %c0_i32 = arith.constant 0 : i32
    %c0_i32_0 = arith.constant 0 : i32
    %c0_i32_1 = arith.constant 0 : i32
    %c0_i32_2 = arith.constant 0 : i32
    return %c0_i32, %c0_i32_0, %c0_i32_1 : i32, i32, i32
  }
  func.func @transform_6(%arg0: i32) -> (i32, i32) {
    %c0_i32 = arith.constant 0 : i32
    %c0_i32_0 = arith.constant 0 : i32
    %c0_i32_1 = arith.constant 0 : i32
    return %c0_i32, %c0_i32_0 : i32, i32
  }
  func.func @transform_7(%arg0: i32) -> (i32, i32, i32) {
    %c0_i32 = arith.constant 0 : i32
    %c0_i32_0 = arith.constant 0 : i32
    %c0_i32_1 = arith.constant 0 : i32
    %c0_i32_2 = arith.constant 0 : i32
    return %c0_i32, %c0_i32_0, %c0_i32_1 : i32, i32, i32
  }
  func.func @transform_8(%arg0: i32) -> (i32, i32, i32) {
    %c0_i32 = arith.constant 0 : i32
    %c0_i32_0 = arith.constant 0 : i32
    %c0_i32_1 = arith.constant 0 : i32
    %c0_i32_2 = arith.constant 0 : i32
    return %c0_i32, %c0_i32_0, %c0_i32_1 : i32, i32, i32
  }
  func.func @transform_9(%arg0: i32) -> (i32, i32) {
    %c0_i32 = arith.constant 0 : i32
    %c0_i32_0 = arith.constant 0 : i32
    %c0_i32_1 = arith.constant 0 : i32
    return %c0_i32, %c0_i32_0 : i32, i32
  }
  func.func @transform_10(%arg0: i32) -> (i32, i32, i32) {
    %c0_i32 = arith.constant 0 : i32
    %c0_i32_0 = arith.constant 0 : i32
    %c0_i32_1 = arith.constant 0 : i32
    %c0_i32_2 = arith.constant 0 : i32
    return %c0_i32, %c0_i32_0, %c0_i32_1 : i32, i32, i32
  }
  func.func @transform_11(%arg0: i32) -> (i32, i32) {
    %c0_i32 = arith.constant 0 : i32
    %c0_i32_0 = arith.constant 0 : i32
    %c0_i32_1 = arith.constant 0 : i32
    return %c0_i32, %c0_i32_0 : i32, i32
  }
  func.func @transform_12(%arg0: i32) -> (i32, i32) {
    %c0_i32 = arith.constant 0 : i32
    %c0_i32_0 = arith.constant 0 : i32
    %c0_i32_1 = arith.constant 0 : i32
    return %c0_i32, %c0_i32_0 : i32, i32
  }
  func.func @transform_13(%arg0: i32) -> (i32, i32) {
    %c0_i32 = arith.constant 0 : i32
    %c0_i32_0 = arith.constant 0 : i32
    %c0_i32_1 = arith.constant 0 : i32
    return %c0_i32, %c0_i32_0 : i32, i32
  }
  func.func @transform_14(%arg0: i32) -> (i32, i32, i32) {
    %c0_i32 = arith.constant 0 : i32
    %c0_i32_0 = arith.constant 0 : i32
    %c0_i32_1 = arith.constant 0 : i32
    return %arg0, %c0_i32, %c0_i32_0 : i32, i32, i32
  }
}

</mosaic_0001>

<bundles_post_ra>
// kernel: dqn_forward.1
= control target key start
LH: loop header
LB: loop body
LE: loop exit
PB: predicated region body
PF: predicated region fallthrough
CT: control target
= control target key end

     0   :  { %s7365_s0 = inlined_call_operand.vmem [shape: bf16[2,36,144], index: 0, kind: input, shape index: {}]   ;;  %s7366_s1 = inlined_call_operand.vmem [shape: bf16[8,8,36], index: 1, kind: input, shape index: {}]   ;;  %s7367_s2 = inlined_call_operand.vmem [shape: bf16[8,144,256], index: 2, kind: input, shape index: {}]   ;;  %s7368_s3 = inlined_call_operand.vmem [shape: f32[1,256], index: 3, kind: input, shape index: {}]   ;;  %s7369_s4 = inlined_call_operand.vmem [shape: bf16[4,3,8], index: 4, kind: input, shape index: {}]   ;;  %s7370_s5 = inlined_call_operand.vmem [shape: bf16[4,256,192], index: 5, kind: input, shape index: {}]   ;;  %s7371_s6 = inlined_call_operand.vmem [shape: f32[1,192], index: 6, kind: input, shape index: {}]   ;;  %s7372_s7 = inlined_call_operand.vmem [shape: bf16[3,1,3], index: 7, kind: input, shape index: {}]   ;;  %s7373_s8 = inlined_call_operand.vmem [shape: bf16[3,192,64], index: 8, kind: input, shape index: {}]   ;;  %s7374_s9 = inlined_call_operand.vmem [shape: f32[1,64], index: 9, kind: input, shape index: {}]   ;;  %s7375_s10 = inlined_call_operand.vmem [shape: bf16[1,64,512], index: 10, kind: input, shape index: {}]   ;;  %s7376_s11 = inlined_call_operand.vmem [shape: f32[1,512], index: 11, kind: input, shape index: {}]   ;;  %s7377_s12 = inlined_call_operand.vmem [shape: bf16[512,128], index: 12, kind: input, shape index: {}]   ;;  %s7378_s13 = inlined_call_operand.vmem [shape: f32[1,128], index: 13, kind: input, shape index: {}]   ;;  %s7379_s14 = inlined_call_operand.hbm [shape: f32[2,1,128], index: 14, kind: output, shape index: {}]  }
   0x1   :  { %7383 = sst [smem:[#allocation8_spill]] %s7365_s0 }
   0x2   :  { %19 = vsyncpa [#allocation3], 0 }
   0x3   :  { %21 = vsyncpa [#allocation3 + $0x1], 0  ;;  %s5924_s29 = smov 0   ;;  %s5926_s30 = smov 0  }
   0x4   :  { %s5928_s15 = smov 0   ;;  %s5930_s16 = smov 0  }
   0x5 LB: > { %7384 = sst [smem:[#allocation5_spill]] %s5840_s15  ;;  %s5945_s17 = sadd.s32 4294967295, %s5844_s16   ;;  %s5844_s16 = sphi %s5930_s16, %s7390_s16   ;;  %s5840_s15 = sphi %s5928_s15, %s7392_s15   ;;  %s5836_s30 = sphi %s5926_s30, %s7394_s30   ;;  %s5832_s29 = sphi %s5924_s29, %s7393_s29  }
   0x6   : > { %s4492_s18 = sadd.s32 4294967294, %s5844_s16   ;;  %s5949_s19 = sadd.s32 1, %s5844_s16  }
   0x7   : > { %7385 = sst [smem:[#allocation6_spill]] %s5949_s19  ;;  %s333_s20 = sadd.s32 1, %s5840_s15 }
   0x8   : > { %s330_s21 = ssub.s32 %s5844_s16, %s5949_s19  ;;  %p343_p0 = scmp.ne.s32.totalorder %s5840_s15, %s5836_s30 }
   0x9   : > { %p331_p1 = scmp.eq.s32.totalorder %s330_s21, 0  ;;  %p344_p2 = scmp.eq.s32.totalorder %s5945_s17, 1 }
   0xa   : > { %p349_p3 = scmp.ne.s32.totalorder %s5836_s30, %s5832_s29  ;;  %p350_p4 = scmp.eq.s32.totalorder %s4492_s18, 1 }
   0xb   : > { %s5960_s22 = scalar_select %p331_p1, %s5840_s15, %s333_s20  }
   0xc   : > { %p5962_p5 = por %p344_p2, %p343_p0  ;;  %p5966_p6 = por %p350_p4, %p349_p3 }
   0xd   : > { %7386 = sst [smem:[#allocation7_spill]] %s5960_s22  ;;  %p4495_p7 = scmp.ge.s32.totalorder %s5844_s16, 1 }
   0xe   : > { %p415_p8 = scmp.lt.s32.totalorder %s5844_s16, 3 }
  0x10   : > { %p416_p9 = pnand %p4495_p7, %p415_p8 }
  0x11   : > { %p460_p10 = scmp.lt.s32.totalorder (!%p416_p9), %s5945_s17, 1  ;;  %v5846_v0 = vmov (!%p416_p9), 0   ;;  %s7389_s0 = sld [smem:[#allocation8_spill]] (!%p416_p9)  ;;  %vm501_vm0 = vcmask (!%p416_p9), 1041408   ;;  %v5280_v8 = vld [vmem:[%s7367_s2 + $0x94] ss:$8 sps:$4 sm:$0xff] (!%p416_p9)  }
  0x12   : > { %419 = sbr.rel (%p416_p9) target bundleno = 2990 (0xbae), region = 76  ;;  %540 = vmatprep.mubr.bf16.mxu0 (!%p416_p9), %v5846_v0  ;;  %606 = vmatprep.mubr.bf16.mxu1 (!%p416_p9), %v5846_v0  ;;  %v5283_v10 = vld [vmem:[%s7367_s2 + $0x4] ss:$8 sps:$4 sm:$0xff] (!%p416_p9)   ;;  %v471_v11 = vld [vmem:[%s7366_s1] sm:$0xf] (!%p416_p9)  ;;  %vm497_vm1 = vcmask (!%p416_p9), 293888  }
  0x13   : > { %v4505_v12 = vld [vmem:[%s7366_s1 + $0x4] sm:$0xf] (!%p416_p9)  ;;  %v5278_v13 = vld [vmem:[%s7367_s2 + $0x90] ss:$8 sps:$4 sm:$0xff] (!%p416_p9)   ;;  %v5281_v14 = vld [vmem:[%s7367_s2] ss:$8 sps:$4 sm:$0xff] (!%p416_p9)  }
  0x14   : > { %v5286_v15 = vld [vmem:[%s7367_s2 + $0xa4] ss:$8 sps:$4 sm:$0xff] (!%p416_p9)   ;;  %v5289_v16 = vld [vmem:[%s7367_s2 + $0x14] ss:$8 sps:$4 sm:$0xff] (!%p416_p9)   ;;  %v5284_v17 = vld [vmem:[%s7367_s2 + $0xa0] ss:$8 sps:$4 sm:$0xff] (!%p416_p9)  }
  0x15   : > { %v5287_v18 = vld [vmem:[%s7367_s2 + $0x10] ss:$8 sps:$4 sm:$0xff] (!%p416_p9)   ;;  %v5292_v19 = vld [vmem:[%s7367_s2 + $0xb4] ss:$8 sps:$4 sm:$0xff] (!%p416_p9)   ;;  %v5295_v20 = vld [vmem:[%s7367_s2 + $0x24] ss:$8 sps:$4 sm:$0xff] (!%p416_p9)  }
  0x16   : > { %v5290_v21 = vld [vmem:[%s7367_s2 + $0xb0] ss:$8 sps:$4 sm:$0xff] (!%p416_p9)   ;;  %v5293_v22 = vld [vmem:[%s7367_s2 + $0x20] ss:$8 sps:$4 sm:$0xff] (!%p416_p9)   ;;  %v5298_v23 = vld [vmem:[%s7367_s2 + $0xc4] ss:$8 sps:$4 sm:$0xff] (!%p416_p9)  }
  0x17   : > { %v5301_v24 = vld [vmem:[%s7367_s2 + $0x34] ss:$8 sps:$4 sm:$0xff] (!%p416_p9)   ;;  %v5296_v25 = vld [vmem:[%s7367_s2 + $0xc0] ss:$8 sps:$4 sm:$0xff] (!%p416_p9)   ;;  %v5299_v26 = vld [vmem:[%s7367_s2 + $0x30] ss:$8 sps:$4 sm:$0xff] (!%p416_p9)  }
  0x18   : > { %v5304_v27 = vld [vmem:[%s7367_s2 + $0xd4] ss:$8 sps:$4 sm:$0xff] (!%p416_p9)   ;;  %v5307_v28 = vld [vmem:[%s7367_s2 + $0x44] ss:$8 sps:$4 sm:$0xff] (!%p416_p9)   ;;  %v5302_v29 = vld [vmem:[%s7367_s2 + $0xd0] ss:$8 sps:$4 sm:$0xff] (!%p416_p9)  }
  0x19   : > { %s461_s25 = scalar_select %p460_p10, %s5945_s17, 1  ;;  %v5305_v30 = vld [vmem:[%s7367_s2 + $0x40] ss:$8 sps:$4 sm:$0xff]   ;;  %v5310_v31 = vld [vmem:[%s7367_s2 + $0xe4] ss:$8 sps:$4 sm:$0xff]   ;;  %vm726_vm2 = vcmask 130048  }
  0x1a   : > { %v5313_v32 = vld [vmem:[%s7367_s2 + $0x54] ss:$8 sps:$4 sm:$0xff]   ;;  %v5308_v33 = vld [vmem:[%s7367_s2 + $0xe0] ss:$8 sps:$4 sm:$0xff]   ;;  %v5311_v34 = vld [vmem:[%s7367_s2 + $0x50] ss:$8 sps:$4 sm:$0xff]  }
  0x1b   : > { %s5228_s26 = smul.u32 40, %s461_s25  ;;  %v5316_v35 = vld [vmem:[%s7367_s2 + $0xf4] ss:$8 sps:$4 sm:$0xff]   ;;  %v5319_v36 = vld [vmem:[%s7367_s2 + $0x64] ss:$8 sps:$4 sm:$0xff]   ;;  %vm2146_vm3 = vcmask 1043456  }
  0x1c   : > { %v5314_v37 = vld [vmem:[%s7367_s2 + $0xf0] ss:$8 sps:$4 sm:$0xff]   ;;  %v5317_v38 = vld [vmem:[%s7367_s2 + $0x60] ss:$8 sps:$4 sm:$0xff]   ;;  %v5322_v39 = vld [vmem:[%s7367_s2 + $0x104] ss:$8 sps:$4 sm:$0xff]  }
  0x1d   : > { %s5979_s18 = scalar_lea.vmem %s7389_s0, %s5228_s26  ;;  %v5325_v40 = vld [vmem:[%s7367_s2 + $0x74] ss:$8 sps:$4 sm:$0xff]   ;;  %v5320_v41 = vld [vmem:[%s7367_s2 + $0x100] ss:$8 sps:$4 sm:$0xff]   ;;  %v5323_v42 = vld [vmem:[%s7367_s2 + $0x70] ss:$8 sps:$4 sm:$0xff]  }
  0x1e   : > { %v5982_v1 = vld [vmem:[%s5979_s18 + $0x4] ss:$8 sps:$4 sm:$0xff]   ;;  %v5272_v2 = vld [vmem:[%s5979_s18] ss:$8 sps:$4 sm:$0xff]   ;;  %v5273_v3 = vld [vmem:[%s5979_s18 + $0x14] ss:$8 sps:$4 sm:$0xff]  }
  0x1f   : > { %508 = vmatprep.subr.bf16.mxu0 %v5982_v1  ;;  %574 = vmatprep.subr.bf16.mxu1 %v5982_v1  ;;  %v470_v4 = vld [vmem:[%s5979_s18 + $0x20] sm:$0x33]  ;;  %v5275_v5 = vld [vmem:[%s5979_s18 + $0x10] ss:$8 sps:$4 sm:$0xff]   ;;  %v5328_v43 = vld [vmem:[%s7367_s2 + $0x114] ss:$8 sps:$4 sm:$0xff]  }
  0x20   : > { %509 = vmatpush1.bf16.msra.mxu0 %v5272_v2  ;;  %575 = vmatpush1.bf16.msra.mxu1 %v5272_v2  ;;  %v5990_v6 = vcombine.high %v470_v4, %v470_v4  ;;  %v4501_v7 = vcombine.low %v470_v4, %v470_v4  ;;  %v5326_v44 = vld [vmem:[%s7367_s2 + $0x110] ss:$8 sps:$4 sm:$0xff]   ;;  %v5331_v45 = vld [vmem:[%s7367_s2 + $0x84] ss:$8 sps:$4 sm:$0xff]   ;;  %v5329_v46 = vld [vmem:[%s7367_s2 + $0x80] ss:$8 sps:$4 sm:$0xff]  }
  0x21   : > { %510 = vmatprep.subr.bf16.mxu0 %v5273_v3  ;;  %576 = vmatprep.subr.bf16.mxu1 %v5273_v3  ;;  %v5334_v47 = vld [vmem:[%s7367_s2 + $0x124] ss:$8 sps:$4 sm:$0xff]   ;;  %v5332_v60 = vld [vmem:[%s7367_s2 + $0x120] ss:$8 sps:$4 sm:$0xff]   ;;  %v5337_v61 = vld [vmem:[%s7367_s2 + $0x134] ss:$8 sps:$4 sm:$0xff]  }
  0x22   : > { %v6000_v9 = vsel %vm501_vm0, %v4501_v7, 0  ;;  %v6130_v62 = vld [vmem:[%s5979_s18] ss:$8 sps:$4 sm:$0xff]   ;;  %v6135_v63 = vld [vmem:[%s5979_s18 + $0x14] ss:$8 sps:$4 sm:$0xff]   ;;  %vm2142_vm4 = vcmask 64512  }
  0x23   : > { %v5340_v2 = vld [vmem:[%s7367_s2 + $0x144] ss:$8 sps:$4 sm:$0xff]   ;;  %v6145_v3 = vld [vmem:[%s5979_s18 + $0x10] ss:$8 sps:$4 sm:$0xff]   ;;  %v5338_v4 = vld [vmem:[%s7367_s2 + $0x140] ss:$8 sps:$4 sm:$0xff]  }
  0x24   : > { %511 = vmatpush1.bf16.msra.mxu0 %v5275_v5  ;;  %577 = vmatpush1.bf16.msra.mxu1 %v5275_v5  ;;  %v5343_v5 = vld [vmem:[%s7367_s2 + $0x154] ss:$8 sps:$4 sm:$0xff]   ;;  %v4564_v7 = vld [vmem:[%s7366_s1 + $0x8] sm:$0xf]  ;;  %vm3302_vm5 = vcmask 1040384   ;;  %vm3298_vm6 = vcmask 23552  }
  0x25   : > { %4503 = vmatprep.subr.msk.bf16.mxu0 %vm501_vm0, %v5990_v6  ;;  %4506 = vmatprep.subr.msk.bf16.mxu1 %vm501_vm0, %v5990_v6  ;;  %vm3523_vm7 = vcmask 523264   ;;  %s458_s25 = sand.u32 1, %s5836_s30   ;;  %s5181_s0 = sshll.u32 %s5945_s17, 4 }
  0x26   : > { %s459_s19 = scalar_lea.vmem [#allocation2], %s458_s25  ;;  %s7323_s20 = scalar_lea.hbm %s7379_s14, %s5181_s0 }
  0x27   : > { %s4437_s28 = sshll.u32 %s459_s19, 4  ;;  %s4425_s15 = scalar_lea.sflag [#allocation3], %s458_s25  ;;  %s7325_s28 = int_to_ptr.vmem [resolvable:$true] %s4437_s28 }
  0x28   : > { %513 = vmatpush1.bf16.msra.mxu0 %v6000_v9  ;;  %579 = vmatpush1.bf16.msra.mxu1 %v6000_v9  ;;  %s5782_s17 = scalar_lea.vmem %s7325_s28, 16  ;;  %s5848_s21 = smov [#allocation2]  }
  0x29   : > { %730 = vmatprep.subr.bf16.mxu0 %v5280_v8  ;;  %864 = vmatprep.subr.bf16.mxu1 %v5283_v10  ;;  %v6161_v8 = vld [vmem:[%s5979_s18 + $0x4] ss:$8 sps:$4 sm:$0xff]   ;;  %v5341_v10 = vld [vmem:[%s7367_s2 + $0x150] ss:$8 sps:$4 sm:$0xff]   ;;  %p5783_p11 = scmp.ne.s32.totalorder %s7325_s28, %s5782_s17  ;;  %s5786_s26 = sshll.u32 %s5848_s21, 4  ;;  %s5787_s26 = int_to_ptr.vmem [resolvable:$false] %s5786_s26 }
  0x2a   : > { %s5788_s27 = scalar_lea.vmem %s5787_s26, 32  ;;  %p5789_p0 = scmp.lt.s32.totalorder %s7325_s28, %s5787_s26 }
  0x2b   : > { %4504 = vmatmul.mubr.msk.bf16.vlgmr.msra.gmra.mrb[0].mxu0 %vm497_vm1, %v471_v11  ;;  %4507 = vmatmul.mubr.msk.bf16.vlgmr.msra.gmra.mrb[0].mxu1 %vm497_vm1, %v4505_v12  ;;  %v5349_v11 = vld [vmem:[%s7367_s2 + $0x164] ss:$8 sps:$4 sm:$0xff]   ;;  %v5347_v12 = vld [vmem:[%s7367_s2 + $0x160] ss:$8 sps:$4 sm:$0xff]   ;;  %p5784_p12 = pnand %p5783_p11, %p5962_p5  ;;  %p5790_p1 = scmp.lt.s32.totalorder %s5788_s27, %s5782_s17 }
  0x2c   : > { %731 = vmatpush1.bf16.msra.mxu0 %v5278_v13  ;;  %865 = vmatpush1.bf16.msra.mxu1 %v5281_v14  ;;  %v5355_v13 = vld [vmem:[%s7367_s2 + $0x174] ss:$8 sps:$4 sm:$0xff]  }
  0x2d   : > { %732 = vmatprep.subr.bf16.mxu0 %v5286_v15  ;;  %866 = vmatprep.subr.bf16.mxu1 %v5289_v16  ;;  %v5346_v14 = vld [vmem:[%s7367_s2 + $0x1b4] ss:$8 sps:$4 sm:$0xff]   ;;  %v5353_v15 = vld [vmem:[%s7367_s2 + $0x170] ss:$8 sps:$4 sm:$0xff]   ;;  %v4604_v16 = vld [vmem:[%s7366_s1 + $0xc] sm:$0xf]  ;;  %p5785_p13 = pneg %p5784_p12  ;;  %p5791_p2 = por %p5790_p1, %p5789_p0 }
  0x2f   : > { %p5792_p3 = pnand %p5791_p2, %p5785_p13 }
  0x30   : > { %733 = vmatpush1.bf16.msra.mxu0 %v5284_v17  ;;  %867 = vmatpush1.bf16.msra.mxu1 %v5287_v18  ;;  %v5344_v17 = vld [vmem:[%s7367_s2 + $0x1b0] ss:$8 sps:$4 sm:$0xff]   ;;  %v5352_v18 = vld [vmem:[%s7367_s2 + $0x1c4] ss:$8 sps:$4 sm:$0xff]  }
  0x31   : > { %734 = vmatprep.subr.bf16.mxu0 %v5292_v19  ;;  %868 = vmatprep.subr.bf16.mxu1 %v5295_v20  ;;  %v5350_v19 = vld [vmem:[%s7367_s2 + $0x1c0] ss:$8 sps:$4 sm:$0xff]   ;;  %v5358_v20 = vld [vmem:[%s7367_s2 + $0x1d4] ss:$8 sps:$4 sm:$0xff]  }
  0x34   : > { %735 = vmatpush1.bf16.msra.mxu0 %v5290_v21  ;;  %869 = vmatpush1.bf16.msra.mxu1 %v5293_v22  ;;  %v5356_v21 = vld [vmem:[%s7367_s2 + $0x1d0] ss:$8 sps:$4 sm:$0xff]   ;;  %v5361_v22 = vld [vmem:[%s7367_s2 + $0x184] ss:$8 sps:$4 sm:$0xff]  }
  0x35   : > { %736 = vmatprep.subr.bf16.mxu0 %v5298_v23  ;;  %870 = vmatprep.subr.bf16.mxu1 %v5301_v24  ;;  %v5364_v23 = vld [vmem:[%s7367_s2 + $0x1e4] ss:$8 sps:$4 sm:$0xff]   ;;  %v5359_v24 = vld [vmem:[%s7367_s2 + $0x180] ss:$8 sps:$4 sm:$0xff]  }
  0x38   : > { %737 = vmatpush1.bf16.msra.mxu0 %v5296_v25  ;;  %871 = vmatpush1.bf16.msra.mxu1 %v5299_v26  ;;  %v5362_v25 = vld [vmem:[%s7367_s2 + $0x1e0] ss:$8 sps:$4 sm:$0xff]   ;;  %v5367_v26 = vld [vmem:[%s7367_s2 + $0x194] ss:$8 sps:$4 sm:$0xff]  }
  0x39   : > { %738 = vmatprep.subr.bf16.mxu0 %v5304_v27  ;;  %872 = vmatprep.subr.bf16.mxu1 %v5307_v28  ;;  %v5370_v27 = vld [vmem:[%s7367_s2 + $0x1f4] ss:$8 sps:$4 sm:$0xff]   ;;  %v5365_v28 = vld [vmem:[%s7367_s2 + $0x190] ss:$8 sps:$4 sm:$0xff]  }
  0x3c   : > { %739 = vmatpush1.bf16.msra.mxu0 %v5302_v29  ;;  %873 = vmatpush1.bf16.msra.mxu1 %v5305_v30  ;;  %v5368_v29 = vld [vmem:[%s7367_s2 + $0x1f0] ss:$8 sps:$4 sm:$0xff]   ;;  %v5373_v30 = vld [vmem:[%s7367_s2 + $0x1a4] ss:$8 sps:$4 sm:$0xff]  }
  0x3d   : > { %740 = vmatprep.subr.bf16.mxu0 %v5310_v31  ;;  %874 = vmatprep.subr.bf16.mxu1 %v5313_v32  ;;  %v5376_v31 = vld [vmem:[%s7367_s2 + $0x204] ss:$8 sps:$4 sm:$0xff]   ;;  %v5371_v32 = vld [vmem:[%s7367_s2 + $0x1a0] ss:$8 sps:$4 sm:$0xff]  }
  0x40   : > { %741 = vmatpush1.bf16.msra.mxu0 %v5308_v33  ;;  %875 = vmatpush1.bf16.msra.mxu1 %v5311_v34  ;;  %v5374_v33 = vld [vmem:[%s7367_s2 + $0x200] ss:$8 sps:$4 sm:$0xff]   ;;  %v5379_v34 = vld [vmem:[%s7367_s2 + $0x214] ss:$8 sps:$4 sm:$0xff]  }
  0x41   : > { %742 = vmatprep.subr.bf16.mxu0 %v5316_v35  ;;  %876 = vmatprep.subr.bf16.mxu1 %v5319_v36  ;;  %v5377_v35 = vld [vmem:[%s7367_s2 + $0x210] ss:$8 sps:$4 sm:$0xff]   ;;  %v5380_v36 = vld [vmem:[%s7367_s2 + $0x220] ss:$8 sps:$4 sm:$0xff]  }
  0x44   : > { %743 = vmatpush1.bf16.msra.mxu0 %v5314_v37  ;;  %877 = vmatpush1.bf16.msra.mxu1 %v5317_v38  ;;  %v5382_v37 = vld [vmem:[%s7367_s2 + $0x224] ss:$8 sps:$4 sm:$0xff]   ;;  %v5385_v38 = vld [vmem:[%s7367_s2 + $0x234] ss:$8 sps:$4 sm:$0xff]  }
  0x45   : > { %744 = vmatprep.subr.bf16.mxu0 %v5322_v39  ;;  %878 = vmatprep.subr.bf16.mxu1 %v5325_v40  ;;  %v5383_v39 = vld [vmem:[%s7367_s2 + $0x230] ss:$8 sps:$4 sm:$0xff]  }
  0x48   : > { %745 = vmatpush1.bf16.msra.mxu0 %v5320_v41  ;;  %879 = vmatpush1.bf16.msra.mxu1 %v5323_v42 }
  0x49   : > { %746 = vmatprep.subr.bf16.mxu0 %v5328_v43  ;;  %880 = vmatprep.subr.bf16.mxu1 %v5331_v45 }
  0x4c   : > { %747 = vmatpush1.bf16.msra.mxu0 %v5326_v44  ;;  %881 = vmatpush1.bf16.msra.mxu1 %v5329_v46 }
  0x4d   : > { %910 = vmatprep.subr.bf16.mxu0 %v5982_v1  ;;  %1065 = vmatprep.subr.bf16.mxu1 %v5334_v47  ;;  %v5335_v1 = vld [vmem:[%s7367_s2 + $0x130] ss:$8 sps:$4 sm:$0xff]  }
  0xfe   : > { %v542_v48 = vpop.f32.mrb[0].mxu0  ;;  %v608_v49 = vpop.f32.mrb[0].mxu1 }
  0xff   : > { %v549_v50 = vpack.c.bf16 %v542_v48, %v542_v48  ;;  %v544_v51 = vpop.f32.mrb[1].mxu0  ;;  %v610_v52 = vpop.f32.mrb[1].mxu1  ;;  %v615_v57 = vpack.c.bf16 %v608_v49, %v608_v49 }
 0x100   : > { %v550_v53 = vpack.c.bf16 %v544_v51, %v544_v51  ;;  %v616_v54 = vpack.c.bf16 %v610_v52, %v610_v52  ;;  %v612_v55 = vpop.f32.mrb[2].mxu1  ;;  %v546_v56 = vpop.f32.mrb[2].mxu0 }
 0x101   : > { %v613_v58 = vpop.f32.mrb[3].mxu1  ;;  %v547_v59 = vpop.f32.mrb[3].mxu0  ;;  %v5388_v56 = vld [vmem:[%s7367_s2 + $0x244] ss:$8 sps:$4 sm:$0xff]  }
 0x102   : > { %4544 = vmatprep.mubr.msk.bf16.mxu0 %vm726_vm2, %v616_v54  ;;  %4563 = vmatprep.mubr.msk.bf16.mxu1 %vm726_vm2, %v550_v53 }
 0x103   : > { %763 = vmatmul.mubr.bf16.vlgmr.msra.gmra.mrb[4].mxu0 %v615_v57  ;;  %897 = vmatmul.mubr.bf16.vlgmr.msra.gmra.mrb[4].mxu1 %v549_v50 }
 0x104   : > { %911 = vmatpush1.bf16.msra.mxu0 %v6130_v62  ;;  %942 = vmatprep.mubr.bf16.mxu0 %v5846_v0 }
 0x105   : > { %912 = vmatprep.subr.bf16.mxu0 %v6135_v63  ;;  %1066 = vmatpush1.bf16.msra.mxu1 %v5332_v60 }
 0x106   : > { %1067 = vmatprep.subr.bf16.mxu1 %v5337_v61  ;;  %v4644_v61 = vld [vmem:[%s7366_s1 + $0x10] sm:$0xf] }
 0x108   : > { %913 = vmatpush1.bf16.msra.mxu0 %v6145_v3 }
 0x109   : > { %4565 = vmatprep.subr.msk.bf16.mxu0 %vm501_vm0, %v5990_v6  ;;  %1068 = vmatpush1.bf16.msra.mxu1 %v5335_v1 }
 0x10a   : > { %1069 = vmatprep.subr.bf16.mxu1 %v5340_v2 }
 0x10c   : > { %915 = vmatpush1.bf16.msra.mxu0 %v6000_v9 }
 0x10d   : > { %1113 = vmatprep.subr.bf16.mxu0 %v6161_v8  ;;  %1070 = vmatpush1.bf16.msra.mxu1 %v5338_v4  ;;  %v5386_v4 = vld [vmem:[%s7367_s2 + $0x240] ss:$8 sps:$4 sm:$0xff]  }
 0x10e   : > { %1071 = vmatprep.subr.bf16.mxu1 %v5343_v5  ;;  %v5391_v5 = vld [vmem:[%s7367_s2 + $0x254] ss:$8 sps:$4 sm:$0xff]  }
 0x10f   : > { %4566 = vmatmul.mubr.msk.bf16.vlgmr.msra.gmra.mrb[8].mxu0 %vm497_vm1, %v4564_v7  ;;  %v5389_v7 = vld [vmem:[%s7367_s2 + $0x250] ss:$8 sps:$4 sm:$0xff]  }
 0x110   : > { %1114 = vmatpush1.bf16.msra.mxu0 %v6130_v62  ;;  %1145 = vmatprep.mubr.bf16.mxu0 %v5846_v0 }
 0x111   : > { %1115 = vmatprep.subr.bf16.mxu0 %v6135_v63  ;;  %1072 = vmatpush1.bf16.msra.mxu1 %v5341_v10  ;;  %v5394_v10 = vld [vmem:[%s7367_s2 + $0x264] ss:$8 sps:$4 sm:$0xff]  }
 0x112   : > { %1073 = vmatprep.subr.bf16.mxu1 %v5349_v11  ;;  %v5392_v11 = vld [vmem:[%s7367_s2 + $0x260] ss:$8 sps:$4 sm:$0xff]  }
 0x114   : > { %1116 = vmatpush1.bf16.msra.mxu0 %v6145_v3 }
 0x115   : > { %4605 = vmatprep.subr.msk.bf16.mxu0 %vm501_vm0, %v5990_v6  ;;  %1074 = vmatpush1.bf16.msra.mxu1 %v5347_v12  ;;  %v5400_v12 = vld [vmem:[%s7367_s2 + $0x2d4] ss:$8 sps:$4 sm:$0xff]  }
 0x116   : > { %1075 = vmatprep.subr.bf16.mxu1 %v5355_v13  ;;  %v5397_v13 = vld [vmem:[%s7367_s2 + $0x274] ss:$8 sps:$4 sm:$0xff]  }
 0x118   : > { %1118 = vmatpush1.bf16.msra.mxu0 %v6000_v9 }
 0x119   : > { %1268 = vmatprep.subr.bf16.mxu0 %v5346_v14  ;;  %1076 = vmatpush1.bf16.msra.mxu1 %v5353_v15  ;;  %v4684_v14 = vld [vmem:[%s7366_s1 + $0x14] sm:$0xf]  ;;  %v5398_v15 = vld [vmem:[%s7367_s2 + $0x2d0] ss:$8 sps:$4 sm:$0xff]  }
 0x11a   : > { %1077 = vmatprep.subr.bf16.mxu1 %v5361_v22  ;;  %v5409_v22 = vld [vmem:[%s7367_s2 + $0x294] ss:$8 sps:$4 sm:$0xff]  }
 0x11b   : > { %4606 = vmatmul.mubr.msk.bf16.vlgmr.msra.gmra.mrb[12].mxu0 %vm497_vm1, %v4604_v16  ;;  %v5395_v16 = vld [vmem:[%s7367_s2 + $0x270] ss:$8 sps:$4 sm:$0xff]  }
 0x11c   : > { %1269 = vmatpush1.bf16.msra.mxu0 %v5344_v17  ;;  %v5406_v17 = vld [vmem:[%s7367_s2 + $0x2e4] ss:$8 sps:$4 sm:$0xff]  }
 0x11d   : > { %1270 = vmatprep.subr.bf16.mxu0 %v5352_v18  ;;  %1078 = vmatpush1.bf16.msra.mxu1 %v5359_v24  ;;  %v5403_v18 = vld [vmem:[%s7367_s2 + $0x284] ss:$8 sps:$4 sm:$0xff]   ;;  %v5407_v24 = vld [vmem:[%s7367_s2 + $0x290] ss:$8 sps:$4 sm:$0xff]  }
 0x11e   : > { %1079 = vmatprep.subr.bf16.mxu1 %v5367_v26  ;;  %v5418_v26 = vld [vmem:[%s7367_s2 + $0x304] ss:$8 sps:$4 sm:$0xff]  }
 0x120   : > { %1271 = vmatpush1.bf16.msra.mxu0 %v5350_v19  ;;  %v5404_v19 = vld [vmem:[%s7367_s2 + $0x2e0] ss:$8 sps:$4 sm:$0xff]  }
 0x121   : > { %1272 = vmatprep.subr.bf16.mxu0 %v5358_v20  ;;  %1080 = vmatpush1.bf16.msra.mxu1 %v5365_v28  ;;  %v5401_v20 = vld [vmem:[%s7367_s2 + $0x280] ss:$8 sps:$4 sm:$0xff]  }
 0x122   : > { %1081 = vmatprep.subr.bf16.mxu1 %v5373_v30  ;;  %v5416_v28 = vld [vmem:[%s7367_s2 + $0x300] ss:$8 sps:$4 sm:$0xff]   ;;  %v5424_v30 = vld [vmem:[%s7367_s2 + $0x314] ss:$8 sps:$4 sm:$0xff]  }
 0x124   : > { %1273 = vmatpush1.bf16.msra.mxu0 %v5356_v21  ;;  %v5412_v21 = vld [vmem:[%s7367_s2 + $0x2f4] ss:$8 sps:$4 sm:$0xff]  }
 0x125   : > { %1274 = vmatprep.subr.bf16.mxu0 %v5364_v23  ;;  %1082 = vmatpush1.bf16.msra.mxu1 %v5371_v32  ;;  %v5410_v23 = vld [vmem:[%s7367_s2 + $0x2f0] ss:$8 sps:$4 sm:$0xff]  }
 0x126   : > { %1316 = vmatprep.subr.bf16.mxu1 %v6161_v8  ;;  %v5422_v32 = vld [vmem:[%s7367_s2 + $0x310] ss:$8 sps:$4 sm:$0xff]  }
 0x128   : > { %1275 = vmatpush1.bf16.msra.mxu0 %v5362_v25  ;;  %v5415_v25 = vld [vmem:[%s7367_s2 + $0x2a4] ss:$8 sps:$4 sm:$0xff]  }
 0x129   : > { %1276 = vmatprep.subr.bf16.mxu0 %v5370_v27  ;;  %v5413_v27 = vld [vmem:[%s7367_s2 + $0x2a0] ss:$8 sps:$4 sm:$0xff]  }
 0x12c   : > { %1277 = vmatpush1.bf16.msra.mxu0 %v5368_v29  ;;  %v5421_v29 = vld [vmem:[%s7367_s2 + $0x2b4] ss:$8 sps:$4 sm:$0xff]  }
 0x12d   : > { %1278 = vmatprep.subr.bf16.mxu0 %v5376_v31  ;;  %v5419_v31 = vld [vmem:[%s7367_s2 + $0x2b0] ss:$8 sps:$4 sm:$0xff]  }
 0x130   : > { %1279 = vmatpush1.bf16.msra.mxu0 %v5374_v33  ;;  %v5427_v33 = vld [vmem:[%s7367_s2 + $0x2c4] ss:$8 sps:$4 sm:$0xff]  }
 0x131   : > { %1280 = vmatprep.subr.bf16.mxu0 %v5379_v34  ;;  %v5430_v34 = vld [vmem:[%s7367_s2 + $0x324] ss:$8 sps:$4 sm:$0xff]  }
 0x134   : > { %1281 = vmatpush1.bf16.msra.mxu0 %v5377_v35  ;;  %v5425_v35 = vld [vmem:[%s7367_s2 + $0x2c0] ss:$8 sps:$4 sm:$0xff]  }
 0x135   : > { %1282 = vmatprep.subr.bf16.mxu0 %v5382_v37  ;;  %v5433_v37 = vld [vmem:[%s7367_s2 + $0x334] ss:$8 sps:$4 sm:$0xff]  }
 0x138   : > { %1283 = vmatpush1.bf16.msra.mxu0 %v5380_v36  ;;  %v5428_v36 = vld [vmem:[%s7367_s2 + $0x320] ss:$8 sps:$4 sm:$0xff]  }
 0x139   : > { %1284 = vmatprep.subr.bf16.mxu0 %v5385_v38  ;;  %v5431_v38 = vld [vmem:[%s7367_s2 + $0x330] ss:$8 sps:$4 sm:$0xff]  }
 0x13c   : > { %1285 = vmatpush1.bf16.msra.mxu0 %v5383_v39  ;;  %v5434_v39 = vld [vmem:[%s7367_s2 + $0x340] ss:$8 sps:$4 sm:$0xff]  }
 0x13d   : > { %1519 = vmatprep.subr.bf16.mxu0 %v6161_v8 }
 0x1d6   : > { %v764_v40 = vpop.f32.mrb[4].mxu0  ;;  %v898_v41 = vpop.f32.mrb[4].mxu1 }
 0x1d7   : > { %v6265_v42 = vadd.f32 %v898_v41, %v764_v40  ;;  %v766_v43 = vpop.f32.mrb[5].mxu0  ;;  %v900_v44 = vpop.f32.mrb[5].mxu1  ;;  %v5436_v40 = vld [vmem:[%s7367_s2 + $0x344] ss:$8 sps:$4 sm:$0xff]   ;;  %v5439_v41 = vld [vmem:[%s7367_s2 + $0x354] ss:$8 sps:$4 sm:$0xff]  }
 0x1d8   : > { %v6267_v45 = vadd.f32 %v900_v44, %v766_v43  ;;  %v768_v46 = vpop.f32.mrb[6].mxu0  ;;  %v902_v47 = vpop.f32.mrb[6].mxu1  ;;  %v5437_v43 = vld [vmem:[%s7367_s2 + $0x350] ss:$8 sps:$4 sm:$0xff]  }
 0x1d9   : > { %v769_v48 = vpop.f32.mrb[7].mxu0  ;;  %v903_v49 = vpop.f32.mrb[7].mxu1 }
 0x1e2   : > { %v944_v50 = vpop.f32.mrb[8].mxu0 }
 0x1e3   : > { %v951_v51 = vpack.c.bf16 %v944_v50, %v944_v50  ;;  %v946_v52 = vpop.f32.mrb[9].mxu0 }
 0x1e4   : > { %v952_v53 = vpack.c.bf16 %v946_v52, %v946_v52  ;;  %v948_v54 = vpop.f32.mrb[10].mxu0 }
 0x1e5   : > { %v949_v55 = vpop.f32.mrb[11].mxu0 }
 0x1e6   : > { %4603 = vmatprep.mubr.msk.bf16.mxu1 %vm726_vm2, %v952_v53 }
 0x1e7   : > { %1098 = vmatmul.mubr.bf16.vlgmr.msra.gmra.mrb[8].mxu1 %v951_v51 }
 0x1e8   : > { %1317 = vmatpush1.bf16.msra.mxu1 %v6130_v62  ;;  %1348 = vmatprep.mubr.bf16.mxu1 %v5846_v0 }
 0x1e9   : > { %1318 = vmatprep.subr.bf16.mxu1 %v6135_v63 }
 0x1ec   : > { %1319 = vmatpush1.bf16.msra.mxu1 %v6145_v3 }
 0x1ed   : > { %4645 = vmatprep.subr.msk.bf16.mxu1 %vm501_vm0, %v5990_v6 }
 0x1ee   : > { %v1147_v57 = vpop.f32.mrb[12].mxu0 }
 0x1ef   : > { %v1149_v58 = vpop.f32.mrb[13].mxu0  ;;  %v1154_v1 = vpack.c.bf16 %v1147_v57, %v1147_v57 }
 0x1f0   : > { %v1155_v59 = vpack.c.bf16 %v1149_v58, %v1149_v58  ;;  %1321 = vmatpush1.bf16.msra.mxu1 %v6000_v9  ;;  %v1151_v60 = vpop.f32.mrb[14].mxu0 }
 0x1f1   : > { %v1152_v2 = vpop.f32.mrb[15].mxu0  ;;  %1471 = vmatprep.subr.bf16.mxu1 %v5388_v56 }
 0x1f2   : > { %4643 = vmatprep.mubr.msk.bf16.mxu0 %vm726_vm2, %v1155_v59 }
 0x1f3   : > { %4646 = vmatmul.mubr.msk.bf16.vlgmr.msra.gmra.mrb[12].mxu1 %vm497_vm1, %v4644_v61  ;;  %1301 = vmatmul.mubr.bf16.vlgmr.msra.gmra.mrb[16].mxu0 %v1154_v1 }
 0x1f4   : > { %1520 = vmatpush1.bf16.msra.mxu0 %v6130_v62  ;;  %1551 = vmatprep.mubr.bf16.mxu0 %v5846_v0 }
 0x1f5   : > { %1521 = vmatprep.subr.bf16.mxu0 %v6135_v63  ;;  %1472 = vmatpush1.bf16.msra.mxu1 %v5386_v4 }
 0x1f6   : > { %1473 = vmatprep.subr.bf16.mxu1 %v5391_v5  ;;  %v4724_v5 = vld [vmem:[%s7366_s1 + $0x18] sm:$0xf] }
 0x1f8   : > { %1522 = vmatpush1.bf16.msra.mxu0 %v6145_v3 }
 0x1f9   : > { %4685 = vmatprep.subr.msk.bf16.mxu0 %vm501_vm0, %v5990_v6  ;;  %1474 = vmatpush1.bf16.msra.mxu1 %v5389_v7 }
 0x1fa   : > { %1475 = vmatprep.subr.bf16.mxu1 %v5394_v10 }
 0x1fc   : > { %1524 = vmatpush1.bf16.msra.mxu0 %v6000_v9 }
 0x1fd   : > { %1476 = vmatpush1.bf16.msra.mxu1 %v5392_v11  ;;  %1674 = vmatprep.subr.bf16.mxu0 %v5400_v12  ;;  %v5440_v11 = vld [vmem:[%s7367_s2 + $0x360] ss:$8 sps:$4 sm:$0xff]   ;;  %v5445_v12 = vld [vmem:[%s7367_s2 + $0x374] ss:$8 sps:$4 sm:$0xff]  }
 0x1fe   : > { %1477 = vmatprep.subr.bf16.mxu1 %v5397_v13  ;;  %v5443_v13 = vld [vmem:[%s7367_s2 + $0x370] ss:$8 sps:$4 sm:$0xff]  }
 0x1ff   : > { %4686 = vmatmul.mubr.msk.bf16.vlgmr.msra.gmra.mrb[20].mxu0 %vm497_vm1, %v4684_v14  ;;  %v5448_v14 = vld [vmem:[%s7367_s2 + $0x384] ss:$8 sps:$4 sm:$0xff]  }
 0x200   : > { %1675 = vmatpush1.bf16.msra.mxu0 %v5398_v15  ;;  %v5451_v15 = vld [vmem:[%s7367_s2 + $0x394] ss:$8 sps:$4 sm:$0xff]  }
 0x201   : > { %1478 = vmatpush1.bf16.msra.mxu1 %v5395_v16  ;;  %1676 = vmatprep.subr.bf16.mxu0 %v5406_v17  ;;  %v5449_v16 = vld [vmem:[%s7367_s2 + $0x390] ss:$8 sps:$4 sm:$0xff]   ;;  %v5460_v17 = vld [vmem:[%s7367_s2 + $0x404] ss:$8 sps:$4 sm:$0xff]  }
 0x202   : > { %1479 = vmatprep.subr.bf16.mxu1 %v5403_v18  ;;  %v5458_v18 = vld [vmem:[%s7367_s2 + $0x400] ss:$8 sps:$4 sm:$0xff]  }
 0x204   : > { %1677 = vmatpush1.bf16.msra.mxu0 %v5404_v19  ;;  %v5455_v19 = vld [vmem:[%s7367_s2 + $0x3a0] ss:$8 sps:$4 sm:$0xff]  }
 0x205   : > { %1480 = vmatpush1.bf16.msra.mxu1 %v5401_v20  ;;  %1678 = vmatprep.subr.bf16.mxu0 %v5412_v21  ;;  %v5463_v20 = vld [vmem:[%s7367_s2 + $0x3b4] ss:$8 sps:$4 sm:$0xff]  }
 0x206   : > { %1481 = vmatprep.subr.bf16.mxu1 %v5409_v22  ;;  %v5466_v21 = vld [vmem:[%s7367_s2 + $0x414] ss:$8 sps:$4 sm:$0xff]   ;;  %v5461_v22 = vld [vmem:[%s7367_s2 + $0x3b0] ss:$8 sps:$4 sm:$0xff]  }
 0x208   : > { %1679 = vmatpush1.bf16.msra.mxu0 %v5410_v23  ;;  %v5464_v23 = vld [vmem:[%s7367_s2 + $0x410] ss:$8 sps:$4 sm:$0xff]  }
 0x209   : > { %1482 = vmatpush1.bf16.msra.mxu1 %v5407_v24  ;;  %1680 = vmatprep.subr.bf16.mxu0 %v5418_v26  ;;  %v5467_v24 = vld [vmem:[%s7367_s2 + $0x3c0] ss:$8 sps:$4 sm:$0xff]  }
 0x20a   : > { %1483 = vmatprep.subr.bf16.mxu1 %v5415_v25  ;;  %v5469_v25 = vld [vmem:[%s7367_s2 + $0x3c4] ss:$8 sps:$4 sm:$0xff]   ;;  %v5470_v26 = vld [vmem:[%s7367_s2 + $0x420] ss:$8 sps:$4 sm:$0xff]  }
 0x20c   : > { %1681 = vmatpush1.bf16.msra.mxu0 %v5416_v28  ;;  %v5475_v28 = vld [vmem:[%s7367_s2 + $0x3d4] ss:$8 sps:$4 sm:$0xff]  }
 0x20d   : > { %1484 = vmatpush1.bf16.msra.mxu1 %v5413_v27  ;;  %1682 = vmatprep.subr.bf16.mxu0 %v5424_v30  ;;  %v5472_v27 = vld [vmem:[%s7367_s2 + $0x424] ss:$8 sps:$4 sm:$0xff]   ;;  %v5473_v30 = vld [vmem:[%s7367_s2 + $0x3d0] ss:$8 sps:$4 sm:$0xff]  }
 0x20e   : > { %1485 = vmatprep.subr.bf16.mxu1 %v5421_v29  ;;  %v5478_v29 = vld [vmem:[%s7367_s2 + $0x434] ss:$8 sps:$4 sm:$0xff]  }
 0x210   : > { %1683 = vmatpush1.bf16.msra.mxu0 %v5422_v32  ;;  %v5481_v32 = vld [vmem:[%s7367_s2 + $0x3e4] ss:$8 sps:$4 sm:$0xff]  }
 0x211   : > { %1486 = vmatpush1.bf16.msra.mxu1 %v5419_v31  ;;  %1684 = vmatprep.subr.bf16.mxu0 %v5430_v34  ;;  %v5476_v31 = vld [vmem:[%s7367_s2 + $0x430] ss:$8 sps:$4 sm:$0xff]   ;;  %v5479_v34 = vld [vmem:[%s7367_s2 + $0x3e0] ss:$8 sps:$4 sm:$0xff]  }
 0x212   : > { %1487 = vmatprep.subr.bf16.mxu1 %v5427_v33  ;;  %v5484_v33 = vld [vmem:[%s7367_s2 + $0x444] ss:$8 sps:$4 sm:$0xff]  }
 0x214   : > { %1685 = vmatpush1.bf16.msra.mxu0 %v5428_v36  ;;  %v5487_v36 = vld [vmem:[%s7367_s2 + $0x454] ss:$8 sps:$4 sm:$0xff]  }
 0x215   : > { %1488 = vmatpush1.bf16.msra.mxu1 %v5425_v35  ;;  %1686 = vmatprep.subr.bf16.mxu0 %v5433_v37  ;;  %v5482_v35 = vld [vmem:[%s7367_s2 + $0x440] ss:$8 sps:$4 sm:$0xff]   ;;  %v5485_v37 = vld [vmem:[%s7367_s2 + $0x450] ss:$8 sps:$4 sm:$0xff]  }
 0x216   : > { %1722 = vmatprep.subr.bf16.mxu1 %v6161_v8 }
 0x218   : > { %1687 = vmatpush1.bf16.msra.mxu0 %v5431_v38  ;;  %v5490_v38 = vld [vmem:[%s7367_s2 + $0x464] ss:$8 sps:$4 sm:$0xff]  }
 0x219   : > { %1688 = vmatprep.subr.bf16.mxu0 %v5436_v40  ;;  %v5493_v40 = vld [vmem:[%s7367_s2 + $0x474] ss:$8 sps:$4 sm:$0xff]  }
 0x21c   : > { %1689 = vmatpush1.bf16.msra.mxu0 %v5434_v39  ;;  %v5488_v39 = vld [vmem:[%s7367_s2 + $0x460] ss:$8 sps:$4 sm:$0xff]  }
 0x21d   : > { %1690 = vmatprep.subr.bf16.mxu0 %v5439_v41  ;;  %v5491_v41 = vld [vmem:[%s7367_s2 + $0x470] ss:$8 sps:$4 sm:$0xff]  }
 0x220   : > { %1691 = vmatpush1.bf16.msra.mxu0 %v5437_v43 }
 0x221   : > { %1925 = vmatprep.subr.bf16.mxu0 %v6161_v8 }
 0x2ba   : > { %v1099_v44 = vpop.f32.mrb[8].mxu1 }
 0x2bb   : > { %v1106_v46 = vadd.f32 %v1099_v44, %v6265_v42  ;;  %v1101_v47 = vpop.f32.mrb[9].mxu1  ;;  %v5442_v42 = vld [vmem:[%s7367_s2 + $0x364] ss:$8 sps:$4 sm:$0xff]  }
 0x2bc   : > { %v1107_v48 = vadd.f32 %v1101_v47, %v6267_v45  ;;  %v1103_v49 = vpop.f32.mrb[10].mxu1 }
 0x2bd   : > { %v1104_v50 = vpop.f32.mrb[11].mxu1 }
 0x2c6   : > { %v1350_v51 = vpop.f32.mrb[12].mxu1  ;;  %v1302_v52 = vpop.f32.mrb[16].mxu0 }
 0x2c7   : > { %v1357_v53 = vpack.c.bf16 %v1350_v51, %v1350_v51  ;;  %v6405_v54 = vadd.f32 %v1302_v52, %v1106_v46  ;;  %v1352_v55 = vpop.f32.mrb[13].mxu1  ;;  %v1304_v56 = vpop.f32.mrb[17].mxu0 }
 0x2c8   : > { %v1358_v57 = vpack.c.bf16 %v1352_v55, %v1352_v55  ;;  %v6407_v58 = vadd.f32 %v1304_v56, %v1107_v48  ;;  %v1306_v59 = vpop.f32.mrb[18].mxu0  ;;  %v1354_v8 = vpop.f32.mrb[14].mxu1 }
 0x2c9   : > { %v1307_v60 = vpop.f32.mrb[19].mxu0  ;;  %v1355_v61 = vpop.f32.mrb[15].mxu1 }
 0x2ca   : > { %4683 = vmatprep.mubr.msk.bf16.mxu1 %vm726_vm2, %v1358_v57 }
 0x2cb   : > { %1504 = vmatmul.mubr.bf16.vlgmr.msra.gmra.mrb[16].mxu1 %v1357_v53 }
 0x2cc   : > { %1723 = vmatpush1.bf16.msra.mxu1 %v6130_v62  ;;  %1754 = vmatprep.mubr.bf16.mxu1 %v5846_v0 }
 0x2cd   : > { %1724 = vmatprep.subr.bf16.mxu1 %v6135_v63 }
 0x2d0   : > { %1725 = vmatpush1.bf16.msra.mxu1 %v6145_v3 }
 0x2d1   : > { %4725 = vmatprep.subr.msk.bf16.mxu1 %vm501_vm0, %v5990_v6 }
 0x2d2   : > { %v1553_v45 = vpop.f32.mrb[20].mxu0 }
 0x2d3   : > { %v1555_v1 = vpop.f32.mrb[21].mxu0  ;;  %v1560_v7 = vpack.c.bf16 %v1553_v45, %v1553_v45 }
 0x2d4   : > { %v1561_v2 = vpack.c.bf16 %v1555_v1, %v1555_v1  ;;  %1727 = vmatpush1.bf16.msra.mxu1 %v6000_v9  ;;  %v1557_v4 = vpop.f32.mrb[22].mxu0 }
 0x2d5   : > { %v1558_v10 = vpop.f32.mrb[23].mxu0  ;;  %1877 = vmatprep.subr.bf16.mxu1 %v5442_v42 }
 0x2d6   : > { %4723 = vmatprep.mubr.msk.bf16.mxu0 %vm726_vm2, %v1561_v2  ;;  %v5547_v10 = vld [vmem:[%s7370_s5 + $0x14] ss:$8 sps:$4 sm:$0xff]  }
 0x2d7   : > { %4726 = vmatmul.mubr.msk.bf16.vlgmr.msra.gmra.mrb[20].mxu1 %vm497_vm1, %v4724_v5  ;;  %1707 = vmatmul.mubr.bf16.vlgmr.msra.gmra.mrb[24].mxu0 %v1560_v7  ;;  %v5542_v5 = vld [vmem:[%s7370_s5] ss:$8 sps:$4 sm:$0xff]   ;;  %v5544_v7 = vld [vmem:[%s7370_s5 + $0x4] ss:$8 sps:$4 sm:$0xff]  }
 0x2d8   : > { %1926 = vmatpush1.bf16.msra.mxu0 %v6130_v62  ;;  %1957 = vmatprep.mubr.bf16.mxu0 %v5846_v0  ;;  %v5446_v62 = vld [vmem:[%s7367_s2 + $0x380] ss:$8 sps:$4 sm:$0xff]  }
 0x2d9   : > { %1927 = vmatprep.subr.bf16.mxu0 %v6135_v63  ;;  %1878 = vmatpush1.bf16.msra.mxu1 %v5440_v11  ;;  %v5454_v63 = vld [vmem:[%s7367_s2 + $0x3f4] ss:$8 sps:$4 sm:$0xff]   ;;  %v5545_v11 = vld [vmem:[%s7370_s5 + $0x10] ss:$8 sps:$4 sm:$0xff]  }
 0x2da   : > { %1879 = vmatprep.subr.bf16.mxu1 %v5445_v12  ;;  %v5550_v12 = vld [vmem:[%s7370_s5 + $0x24] ss:$8 sps:$4 sm:$0xff]  }
 0x2dc   : > { %1928 = vmatpush1.bf16.msra.mxu0 %v6145_v3  ;;  %v5452_v3 = vld [vmem:[%s7367_s2 + $0x3f0] ss:$8 sps:$4 sm:$0xff]  }
 0x2dd   : > { %4765 = vmatprep.subr.msk.bf16.mxu0 %vm501_vm0, %v5990_v6  ;;  %1880 = vmatpush1.bf16.msra.mxu1 %v5443_v13  ;;  %v4764_v6 = vld [vmem:[%s7366_s1 + $0x1c] sm:$0xf]  ;;  %v5548_v13 = vld [vmem:[%s7370_s5 + $0x20] ss:$8 sps:$4 sm:$0xff]  }
 0x2de   : > { %1881 = vmatprep.subr.bf16.mxu1 %v5448_v14  ;;  %v5553_v14 = vld [vmem:[%s7370_s5 + $0x34] ss:$8 sps:$4 sm:$0xff]  }
 0x2e0   : > { %1930 = vmatpush1.bf16.msra.mxu0 %v6000_v9  ;;  %v5457_v9 = vld [vmem:[%s7367_s2 + $0x3a4] ss:$8 sps:$4 sm:$0xff]  }
 0x2e1   : > { %1882 = vmatpush1.bf16.msra.mxu1 %v5446_v62  ;;  %2080 = vmatprep.subr.bf16.mxu0 %v5454_v63  ;;  %v5551_v62 = vld [vmem:[%s7370_s5 + $0x30] ss:$8 sps:$4 sm:$0xff]   ;;  %v5556_v63 = vld [vmem:[%s7370_s5 + $0x44] ss:$8 sps:$4 sm:$0xff]  }
 0x2e2   : > { %1883 = vmatprep.subr.bf16.mxu1 %v5451_v15  ;;  %v5554_v15 = vld [vmem:[%s7370_s5 + $0x40] ss:$8 sps:$4 sm:$0xff]  }
 0x2e3   : > { %4766 = vmatmul.mubr.msk.bf16.vlgmr.msra.gmra.mrb[28].mxu0 %vm497_vm1, %v4764_v6  ;;  %v5559_v6 = vld [vmem:[%s7370_s5 + $0x54] ss:$8 sps:$4 sm:$0xff]  }
 0x2e4   : > { %2081 = vmatpush1.bf16.msra.mxu0 %v5452_v3  ;;  %v5557_v3 = vld [vmem:[%s7370_s5 + $0x50] ss:$8 sps:$4 sm:$0xff]  }
 0x2e5   : > { %1884 = vmatpush1.bf16.msra.mxu1 %v5449_v16  ;;  %2082 = vmatprep.subr.bf16.mxu0 %v5460_v17  ;;  %v5562_v16 = vld [vmem:[%s7370_s5 + $0x64] ss:$8 sps:$4 sm:$0xff]   ;;  %v5560_v17 = vld [vmem:[%s7370_s5 + $0x60] ss:$8 sps:$4 sm:$0xff]  }
 0x2e6   : > { %1885 = vmatprep.subr.bf16.mxu1 %v5457_v9  ;;  %v5565_v9 = vld [vmem:[%s7370_s5 + $0x74] ss:$8 sps:$4 sm:$0xff]  }
 0x2e8   : > { %2083 = vmatpush1.bf16.msra.mxu0 %v5458_v18  ;;  %v5563_v18 = vld [vmem:[%s7370_s5 + $0x70] ss:$8 sps:$4 sm:$0xff]  }
 0x2e9   : > { %1886 = vmatpush1.bf16.msra.mxu1 %v5455_v19  ;;  %2084 = vmatprep.subr.bf16.mxu0 %v5466_v21  ;;  %v5568_v19 = vld [vmem:[%s7370_s5 + $0x84] ss:$8 sps:$4 sm:$0xff]   ;;  %v5566_v21 = vld [vmem:[%s7370_s5 + $0x80] ss:$8 sps:$4 sm:$0xff]  }
 0x2ea   : > { %1887 = vmatprep.subr.bf16.mxu1 %v5463_v20  ;;  %v2125_v20 = vlaneseq }
 0x2ec   : > { %2085 = vmatpush1.bf16.msra.mxu0 %v5464_v23  ;;  %v5571_v23 = vld [vmem:[%s7370_s5 + $0x94] ss:$8 sps:$4 sm:$0xff]  }
 0x2ed   : > { %1888 = vmatpush1.bf16.msra.mxu1 %v5461_v22  ;;  %2086 = vmatprep.subr.bf16.mxu0 %v5472_v27 }
 0x2ee   : > { %1889 = vmatprep.subr.bf16.mxu1 %v5469_v25 }
 0x2f0   : > { %2087 = vmatpush1.bf16.msra.mxu0 %v5470_v26 }
 0x2f1   : > { %1890 = vmatpush1.bf16.msra.mxu1 %v5467_v24  ;;  %2088 = vmatprep.subr.bf16.mxu0 %v5478_v29  ;;  %v6603_v29 = vshrl.u32 %v2125_v20, 7  ;;  %v5529_v20 = vld [vmem:[%s7370_s5 + $0x1b4] ss:$8 sps:$4 sm:$0xff]  }
 0x2f2   : > { %1891 = vmatprep.subr.bf16.mxu1 %v5475_v28 }
 0x2f4   : > { %2089 = vmatpush1.bf16.msra.mxu0 %v5476_v31  ;;  %v5574_v31 = vld [vmem:[%s7370_s5 + $0xa4] ss:$8 sps:$4 sm:$0xff]  }
 0x2f5   : > { %1892 = vmatpush1.bf16.msra.mxu1 %v5473_v30  ;;  %2090 = vmatprep.subr.bf16.mxu0 %v5484_v33  ;;  %v5569_v30 = vld [vmem:[%s7370_s5 + $0x90] ss:$8 sps:$4 sm:$0xff]   ;;  %v5572_v33 = vld [vmem:[%s7370_s5 + $0xa0] ss:$8 sps:$4 sm:$0xff]  }
 0x2f6   : > { %1893 = vmatprep.subr.bf16.mxu1 %v5481_v32  ;;  %v6612_v32 = vsub.s32 0, %v6603_v29 }
 0x2f8   : > { %2091 = vmatpush1.bf16.msra.mxu0 %v5482_v35  ;;  %v6621_v35 = vsub.s32 1, %v6603_v29 }
 0x2f9   : > { %1894 = vmatpush1.bf16.msra.mxu1 %v5479_v34  ;;  %2092 = vmatprep.subr.bf16.mxu0 %v5487_v36  ;;  %v2123_v34 = vld [vmem:[%s7368_s3] sm:$0x3]  ;;  %v5577_v36 = vld [vmem:[%s7370_s5 + $0xb4] ss:$8 sps:$4 sm:$0xff]  }
 0x2fc   : > { %2093 = vmatpush1.bf16.msra.mxu0 %v5485_v37  ;;  %v2128_v37 = vrot.slane %v2123_v34, %v6612_v32 }
 0x2fd   : > { %2094 = vmatprep.subr.bf16.mxu0 %v5490_v38  ;;  %v5575_v38 = vld [vmem:[%s7370_s5 + $0xb0] ss:$8 sps:$4 sm:$0xff]  }
 0x300   : > { %2095 = vmatpush1.bf16.msra.mxu0 %v5488_v39 }
 0x301   : > { %2096 = vmatprep.subr.bf16.mxu0 %v5493_v40  ;;  %v2132_v40 = vrot.slane %v2123_v34, %v6621_v35  ;;  %v5592_v34 = vld [vmem:[%s7370_s5 + $0x204] ss:$8 sps:$4 sm:$0xff]  }
 0x304   : > { %2097 = vmatpush1.bf16.msra.mxu0 %v5491_v41  ;;  %v5580_v41 = vld [vmem:[%s7370_s5 + $0xc4] ss:$8 sps:$4 sm:$0xff]  }
 0x305   : > { %2670 = vmatprep.subr.bf16.mxu0 %v5544_v7  ;;  %v5505_v7 = vld [vmem:[%s7370_s5 + $0x134] ss:$8 sps:$4 sm:$0xff]  }
 0x39e   : > { %v1505_v43 = vpop.f32.mrb[16].mxu1 }
 0x39f   : > { %v1512_v44 = vadd.f32 %v1505_v43, %v6405_v54  ;;  %v1507_v46 = vpop.f32.mrb[17].mxu1 }
 0x3a0   : > { %v1513_v47 = vadd.f32 %v1507_v46, %v6407_v58  ;;  %v1509_v48 = vpop.f32.mrb[18].mxu1 }
 0x3a1   : > { %v1510_v49 = vpop.f32.mrb[19].mxu1 }
 0x3aa   : > { %v1756_v50 = vpop.f32.mrb[20].mxu1  ;;  %v1708_v51 = vpop.f32.mrb[24].mxu0 }
 0x3ab   : > { %v1763_v52 = vpack.c.bf16 %v1756_v50, %v1756_v50  ;;  %v1715_v53 = vadd.f32 %v1708_v51, %v1512_v44  ;;  %v1758_v55 = vpop.f32.mrb[21].mxu1  ;;  %v1710_v56 = vpop.f32.mrb[25].mxu0  ;;  %v5578_v50 = vld [vmem:[%s7370_s5 + $0xc0] ss:$8 sps:$4 sm:$0xff]  }
 0x3ac   : > { %v1764_v57 = vpack.c.bf16 %v1758_v55, %v1758_v55  ;;  %v1716_v59 = vadd.f32 %v1710_v56, %v1513_v47  ;;  %v1712_v8 = vpop.f32.mrb[26].mxu0  ;;  %v1760_v60 = vpop.f32.mrb[22].mxu1 }
 0x3ad   : > { %v1713_v61 = vpop.f32.mrb[27].mxu0  ;;  %v1761_v42 = vpop.f32.mrb[23].mxu1  ;;  %v5586_v8 = vld [vmem:[%s7370_s5 + $0xe4] ss:$8 sps:$4 sm:$0xff]  }
 0x3ae   : > { %4763 = vmatprep.mubr.msk.bf16.mxu1 %vm726_vm2, %v1764_v57  ;;  %v5581_v57 = vld [vmem:[%s7370_s5 + $0xd0] ss:$8 sps:$4 sm:$0xff]   ;;  %v2141_v61 = vld [vmem:[%s7369_s4] sm:$0x3]  ;;  %v5496_v42 = vld [vmem:[%s7370_s5 + $0x104] ss:$8 sps:$4 sm:$0xff]  }
 0x3af   : > { %1910 = vmatmul.mubr.bf16.vlgmr.msra.gmra.mrb[24].mxu1 %v1763_v52  ;;  %v5583_v52 = vld [vmem:[%s7370_s5 + $0xd4] ss:$8 sps:$4 sm:$0xff]  }
 0x3b0   : > { %2185 = vmatprep.mubr.bf16.mxu1 %v5846_v0 }
 0x3b6   : > { %v1959_v54 = vpop.f32.mrb[28].mxu0 }
 0x3b7   : > { %v1961_v58 = vpop.f32.mrb[29].mxu0  ;;  %v1966_v2 = vpack.c.bf16 %v1959_v54, %v1959_v54  ;;  %v5584_v54 = vld [vmem:[%s7370_s5 + $0xe0] ss:$8 sps:$4 sm:$0xff]  }
 0x3b8   : > { %v1967_v45 = vpack.c.bf16 %v1961_v58, %v1961_v58  ;;  %v1963_v1 = vpop.f32.mrb[30].mxu0  ;;  %v5494_v58 = vld [vmem:[%s7370_s5 + $0x100] ss:$8 sps:$4 sm:$0xff]  }
 0x3b9   : > { %v1964_v4 = vpop.f32.mrb[31].mxu0  ;;  %v5499_v1 = vld [vmem:[%s7370_s5 + $0x114] ss:$8 sps:$4 sm:$0xff]  }
 0x3ba   : > { %4803 = vmatprep.mubr.msk.bf16.mxu0 %vm726_vm2, %v1967_v45  ;;  %v4806_v45 = vld [vmem:[%s7369_s4 + $0x2] sm:$0x3]  ;;  %v5502_v4 = vld [vmem:[%s7370_s5 + $0x124] ss:$8 sps:$4 sm:$0xff]  }
 0x3bb   : > { %2113 = vmatmul.mubr.bf16.vlgmr.msra.gmra.mrb[32].mxu0 %v1966_v2  ;;  %v5497_v2 = vld [vmem:[%s7370_s5 + $0x110] ss:$8 sps:$4 sm:$0xff]  }
 0x3bc   : > { %2671 = vmatpush1.bf16.msra.mxu0 %v5542_v5  ;;  %v5500_v5 = vld [vmem:[%s7370_s5 + $0x120] ss:$8 sps:$4 sm:$0xff]  }
 0x3bd   : > { %2672 = vmatprep.subr.bf16.mxu0 %v5547_v10  ;;  %v5503_v10 = vld [vmem:[%s7370_s5 + $0x130] ss:$8 sps:$4 sm:$0xff]  }
 0x3c0   : > { %2673 = vmatpush1.bf16.msra.mxu0 %v5545_v11  ;;  %v5508_v11 = vld [vmem:[%s7370_s5 + $0x144] ss:$8 sps:$4 sm:$0xff]  }
 0x3c1   : > { %2674 = vmatprep.subr.bf16.mxu0 %v5550_v12  ;;  %v5506_v12 = vld [vmem:[%s7370_s5 + $0x140] ss:$8 sps:$4 sm:$0xff]  }
 0x3c4   : > { %2675 = vmatpush1.bf16.msra.mxu0 %v5548_v13  ;;  %v5511_v13 = vld [vmem:[%s7370_s5 + $0x154] ss:$8 sps:$4 sm:$0xff]  }
 0x3c5   : > { %2676 = vmatprep.subr.bf16.mxu0 %v5553_v14  ;;  %v5509_v14 = vld [vmem:[%s7370_s5 + $0x150] ss:$8 sps:$4 sm:$0xff]  }
 0x3c8   : > { %2677 = vmatpush1.bf16.msra.mxu0 %v5551_v62  ;;  %v5514_v62 = vld [vmem:[%s7370_s5 + $0x164] ss:$8 sps:$4 sm:$0xff]  }
 0x3c9   : > { %2678 = vmatprep.subr.bf16.mxu0 %v5556_v63  ;;  %v5512_v63 = vld [vmem:[%s7370_s5 + $0x160] ss:$8 sps:$4 sm:$0xff]  }
 0x3cc   : > { %2679 = vmatpush1.bf16.msra.mxu0 %v5554_v15  ;;  %v5517_v15 = vld [vmem:[%s7370_s5 + $0x174] ss:$8 sps:$4 sm:$0xff]  }
 0x3cd   : > { %2680 = vmatprep.subr.bf16.mxu0 %v5559_v6  ;;  %v5515_v6 = vld [vmem:[%s7370_s5 + $0x170] ss:$8 sps:$4 sm:$0xff]  }
 0x3d0   : > { %2681 = vmatpush1.bf16.msra.mxu0 %v5557_v3  ;;  %v5520_v3 = vld [vmem:[%s7370_s5 + $0x184] ss:$8 sps:$4 sm:$0xff]  }
 0x3d1   : > { %2682 = vmatprep.subr.bf16.mxu0 %v5562_v16  ;;  %v5518_v16 = vld [vmem:[%s7370_s5 + $0x180] ss:$8 sps:$4 sm:$0xff]  }
 0x3d4   : > { %2683 = vmatpush1.bf16.msra.mxu0 %v5560_v17  ;;  %v5523_v17 = vld [vmem:[%s7370_s5 + $0x194] ss:$8 sps:$4 sm:$0xff]  }
 0x3d5   : > { %2684 = vmatprep.subr.bf16.mxu0 %v5565_v9  ;;  %v5521_v9 = vld [vmem:[%s7370_s5 + $0x190] ss:$8 sps:$4 sm:$0xff]  }
 0x3d8   : > { %2685 = vmatpush1.bf16.msra.mxu0 %v5563_v18  ;;  %v5526_v18 = vld [vmem:[%s7370_s5 + $0x1a4] ss:$8 sps:$4 sm:$0xff]  }
 0x3d9   : > { %2686 = vmatprep.subr.bf16.mxu0 %v5568_v19  ;;  %v5524_v19 = vld [vmem:[%s7370_s5 + $0x1a0] ss:$8 sps:$4 sm:$0xff]  }
 0x3dc   : > { %2687 = vmatpush1.bf16.msra.mxu0 %v5566_v21  ;;  %v5527_v21 = vld [vmem:[%s7370_s5 + $0x1b0] ss:$8 sps:$4 sm:$0xff]  }
 0x3dd   : > { %2688 = vmatprep.subr.bf16.mxu0 %v5571_v23  ;;  %v5530_v23 = vld [vmem:[%s7370_s5 + $0x1c0] ss:$8 sps:$4 sm:$0xff]  }
 0x3e0   : > { %2689 = vmatpush1.bf16.msra.mxu0 %v5569_v30  ;;  %v5539_v30 = vld [vmem:[%s7370_s5 + $0x1f0] ss:$8 sps:$4 sm:$0xff]  }
 0x3e1   : > { %2690 = vmatprep.subr.bf16.mxu0 %v5574_v31  ;;  %v5589_v31 = vld [vmem:[%s7370_s5 + $0xf4] ss:$8 sps:$4 sm:$0xff]  }
 0x3e4   : > { %2691 = vmatpush1.bf16.msra.mxu0 %v5572_v33  ;;  %v5587_v33 = vld [vmem:[%s7370_s5 + $0xf0] ss:$8 sps:$4 sm:$0xff]  }
 0x3e5   : > { %2692 = vmatprep.subr.bf16.mxu0 %v5577_v36 }
 0x3e8   : > { %2693 = vmatpush1.bf16.msra.mxu0 %v5575_v38 }
 0x3e9   : > { %2694 = vmatprep.subr.bf16.mxu0 %v5580_v41 }
 0x3ec   : > { %2695 = vmatpush1.bf16.msra.mxu0 %v5578_v50 }
 0x3ed   : > { %2696 = vmatprep.subr.bf16.mxu0 %v5583_v52 }
 0x3f0   : > { %2697 = vmatpush1.bf16.msra.mxu0 %v5581_v57  ;;  %v5602_v57 = vld [vmem:[%s7370_s5 + $0x230] ss:$8 sps:$4 sm:$0xff]  }
 0x3f1   : > { %2698 = vmatprep.subr.bf16.mxu0 %v5586_v8  ;;  %v5610_v8 = vld [vmem:[%s7370_s5 + $0x244] ss:$8 sps:$4 sm:$0xff]  }
 0x3f4   : > { %2699 = vmatpush1.bf16.msra.mxu0 %v5584_v54  ;;  %v5616_v54 = vld [vmem:[%s7370_s5 + $0x254] ss:$8 sps:$4 sm:$0xff]  }
 0x3f5   : > { %2700 = vmatprep.subr.bf16.mxu0 %v5589_v31  ;;  %v5656_v31 = vld [vmem:[%s7370_s5 + $0x2c0] ss:$8 sps:$4 sm:$0xff]  }
 0x3f8   : > { %2701 = vmatpush1.bf16.msra.mxu0 %v5587_v33  ;;  %v5658_v33 = vld [vmem:[%s7370_s5 + $0x2c4] ss:$8 sps:$4 sm:$0xff]  }
 0x3f9   : > { %2952 = vmatprep.subr.bf16.mxu0 %v5592_v34  ;;  %v5659_v34 = vld [vmem:[%s7370_s5 + $0x3a0] ss:$8 sps:$4 sm:$0xff]  }
 0x482   : > { %v1911_v22 = vpop.f32.mrb[24].mxu1 }
 0x483   : > { %v1918_v24 = vadd.f32 %v1911_v22, %v1715_v53  ;;  %v1913_v25 = vpop.f32.mrb[25].mxu1  ;;  %v5532_v22 = vld [vmem:[%s7370_s5 + $0x1c4] ss:$8 sps:$4 sm:$0xff]  }
 0x484   : > { %v1919_v26 = vadd.f32 %v1913_v25, %v1716_v59  ;;  %v1915_v27 = vpop.f32.mrb[26].mxu1  ;;  %v5533_v25 = vld [vmem:[%s7370_s5 + $0x1d0] ss:$8 sps:$4 sm:$0xff]  }
 0x485   : > { %v1916_v28 = vpop.f32.mrb[27].mxu1  ;;  %v5536_v27 = vld [vmem:[%s7370_s5 + $0x1e0] ss:$8 sps:$4 sm:$0xff]  }
 0x486   : > { %v5541_v28 = vld [vmem:[%s7370_s5 + $0x1f4] ss:$8 sps:$4 sm:$0xff]  }
 0x48e   : > { %v2114_v39 = vpop.f32.mrb[32].mxu0 }
 0x48f   : > { %v2121_v43 = vadd.f32 %v2114_v39, %v1918_v24  ;;  %v2116_v44 = vpop.f32.mrb[33].mxu0  ;;  %v5535_v24 = vld [vmem:[%s7370_s5 + $0x1d4] ss:$8 sps:$4 sm:$0xff]  }
 0x490   : > { %v2122_v46 = vadd.f32 %v2116_v44, %v1919_v26  ;;  %v2118_v47 = vpop.f32.mrb[34].mxu0  ;;  %v5538_v26 = vld [vmem:[%s7370_s5 + $0x1e4] ss:$8 sps:$4 sm:$0xff]   ;;  %v5595_v44 = vld [vmem:[%s7370_s5 + $0x214] ss:$8 sps:$4 sm:$0xff]  }
 0x491   : > { %v2135_v48 = vadd.f32 %v2128_v37, %v2121_v43  ;;  %v2119_v49 = vpop.f32.mrb[35].mxu0  ;;  %v5598_v47 = vld [vmem:[%s7370_s5 + $0x224] ss:$8 sps:$4 sm:$0xff]  }
 0x492   : > { %v2136_v51 = vadd.f32 %v2132_v40, %v2122_v46  ;;  %v5590_v40 = vld [vmem:[%s7370_s5 + $0x200] ss:$8 sps:$4 sm:$0xff]   ;;  %v5593_v46 = vld [vmem:[%s7370_s5 + $0x210] ss:$8 sps:$4 sm:$0xff]  }
 0x493   : > { %v2137_v53 = vmax.f32 %v2135_v48, 0.0 }
 0x494   : > { %v2138_v55 = vmax.f32 %v2136_v51, 0.0 }
 0x495   : > { %v2139_v56 = vpack.c.bf16 %v2137_v53, %v2137_v53 }
 0x496   : > { %v6643_v59 = vpack.c.bf16 %v2138_v55, %v2138_v55  ;;  %v5596_v55 = vld [vmem:[%s7370_s5 + $0x220] ss:$8 sps:$4 sm:$0xff]  }
 0x497   : > { %v6649_v60 = vsel %vm2146_vm3, %v2139_v56, 0  ;;  %v5604_v56 = vld [vmem:[%s7370_s5 + $0x234] ss:$8 sps:$4 sm:$0xff]  }
 0x498   : > { %4804 = vmatprep.subr.msk.bf16.mxu1 %vm2146_vm3, %v6643_v59 }
 0x499   : > { %2154 = vmatpush1.bf16.msra.mxu1 %v6649_v60 }
 0x49a   : > { %4807 = vmatprep.subr.msk.bf16.mxu1 %vm2146_vm3, %v6643_v59 }
 0x49c   : > { %4805 = vmatmul.mubr.msk.bf16.vlgmr.msra.gmra.mrb[28].mxu1 %vm2142_vm4, %v2141_v61  ;;  %v4905_v61 = vld [vmem:[%s7369_s4 + $0x4] sm:$0x3] }
 0x49d   : > { %2234 = vmatpush1.bf16.msra.mxu1 %v6649_v60  ;;  %2265 = vmatprep.mubr.bf16.mxu1 %v5846_v0 }
 0x49e   : > { %2469 = vmatprep.subr.bf16.mxu1 %v5496_v42  ;;  %v5601_v42 = vld [vmem:[%s7370_s5 + $0x304] ss:$8 sps:$4 sm:$0xff]  }
 0x4a4   : > { %4808 = vmatmul.mubr.msk.bf16.vlgmr.msra.gmra.mrb[32].mxu1 %vm2142_vm4, %v4806_v45  ;;  %v5622_v45 = vld [vmem:[%s7370_s5 + $0x264] ss:$8 sps:$4 sm:$0xff]  }
 0x4a5   : > { %2470 = vmatpush1.bf16.msra.mxu1 %v5494_v58  ;;  %v5614_v58 = vld [vmem:[%s7370_s5 + $0x250] ss:$8 sps:$4 sm:$0xff]  }
 0x4a6   : > { %2471 = vmatprep.subr.bf16.mxu1 %v5499_v1  ;;  %v4972_v1 = vld [vmem:[%s7369_s4 + $0x6] sm:$0x3] }
 0x4a9   : > { %2472 = vmatpush1.bf16.msra.mxu1 %v5497_v2  ;;  %v5607_v2 = vld [vmem:[%s7370_s5 + $0x314] ss:$8 sps:$4 sm:$0xff]  }
 0x4aa   : > { %2473 = vmatprep.subr.bf16.mxu1 %v5502_v4  ;;  %v5620_v4 = vld [vmem:[%s7370_s5 + $0x260] ss:$8 sps:$4 sm:$0xff]  }
 0x4ad   : > { %2474 = vmatpush1.bf16.msra.mxu1 %v5500_v5  ;;  %v5628_v5 = vld [vmem:[%s7370_s5 + $0x274] ss:$8 sps:$4 sm:$0xff]  }
 0x4ae   : > { %2475 = vmatprep.subr.bf16.mxu1 %v5505_v7  ;;  %v5605_v7 = vld [vmem:[%s7370_s5 + $0x310] ss:$8 sps:$4 sm:$0xff]  }
 0x4b1   : > { %2476 = vmatpush1.bf16.msra.mxu1 %v5503_v10  ;;  %v5613_v10 = vld [vmem:[%s7370_s5 + $0x324] ss:$8 sps:$4 sm:$0xff]  }
 0x4b2   : > { %2477 = vmatprep.subr.bf16.mxu1 %v5508_v11  ;;  %v5626_v11 = vld [vmem:[%s7370_s5 + $0x270] ss:$8 sps:$4 sm:$0xff]  }
 0x4b5   : > { %2478 = vmatpush1.bf16.msra.mxu1 %v5506_v12  ;;  %v5634_v12 = vld [vmem:[%s7370_s5 + $0x284] ss:$8 sps:$4 sm:$0xff]  }
 0x4b6   : > { %2479 = vmatprep.subr.bf16.mxu1 %v5511_v13  ;;  %v5611_v13 = vld [vmem:[%s7370_s5 + $0x320] ss:$8 sps:$4 sm:$0xff]  }
 0x4b9   : > { %2480 = vmatpush1.bf16.msra.mxu1 %v5509_v14  ;;  %v5619_v14 = vld [vmem:[%s7370_s5 + $0x334] ss:$8 sps:$4 sm:$0xff]  }
 0x4ba   : > { %2481 = vmatprep.subr.bf16.mxu1 %v5514_v62  ;;  %v5632_v62 = vld [vmem:[%s7370_s5 + $0x280] ss:$8 sps:$4 sm:$0xff]  }
 0x4bd   : > { %2482 = vmatpush1.bf16.msra.mxu1 %v5512_v63  ;;  %v5640_v63 = vld [vmem:[%s7370_s5 + $0x294] ss:$8 sps:$4 sm:$0xff]  }
 0x4be   : > { %2483 = vmatprep.subr.bf16.mxu1 %v5517_v15  ;;  %v5617_v15 = vld [vmem:[%s7370_s5 + $0x330] ss:$8 sps:$4 sm:$0xff]  }
 0x4c1   : > { %2484 = vmatpush1.bf16.msra.mxu1 %v5515_v6  ;;  %v5625_v6 = vld [vmem:[%s7370_s5 + $0x344] ss:$8 sps:$4 sm:$0xff]  }
 0x4c2   : > { %2485 = vmatprep.subr.bf16.mxu1 %v5520_v3  ;;  %v5638_v3 = vld [vmem:[%s7370_s5 + $0x290] ss:$8 sps:$4 sm:$0xff]  }
 0x4c5   : > { %2486 = vmatpush1.bf16.msra.mxu1 %v5518_v16  ;;  %v5646_v16 = vld [vmem:[%s7370_s5 + $0x2a4] ss:$8 sps:$4 sm:$0xff]  }
 0x4c6   : > { %2487 = vmatprep.subr.bf16.mxu1 %v5523_v17  ;;  %v5623_v17 = vld [vmem:[%s7370_s5 + $0x340] ss:$8 sps:$4 sm:$0xff]  }
 0x4c9   : > { %2488 = vmatpush1.bf16.msra.mxu1 %v5521_v9  ;;  %v5631_v9 = vld [vmem:[%s7370_s5 + $0x354] ss:$8 sps:$4 sm:$0xff]  }
 0x4ca   : > { %2489 = vmatprep.subr.bf16.mxu1 %v5526_v18  ;;  %v5644_v18 = vld [vmem:[%s7370_s5 + $0x2a0] ss:$8 sps:$4 sm:$0xff]  }
 0x4cd   : > { %2490 = vmatpush1.bf16.msra.mxu1 %v5524_v19  ;;  %v5629_v19 = vld [vmem:[%s7370_s5 + $0x350] ss:$8 sps:$4 sm:$0xff]  }
 0x4ce   : > { %2491 = vmatprep.subr.bf16.mxu1 %v5529_v20  ;;  %v5637_v20 = vld [vmem:[%s7370_s5 + $0x364] ss:$8 sps:$4 sm:$0xff]  }
 0x4d1   : > { %2492 = vmatpush1.bf16.msra.mxu1 %v5527_v21  ;;  %v5635_v21 = vld [vmem:[%s7370_s5 + $0x360] ss:$8 sps:$4 sm:$0xff]  }
 0x4d2   : > { %2493 = vmatprep.subr.bf16.mxu1 %v5532_v22  ;;  %v5643_v22 = vld [vmem:[%s7370_s5 + $0x374] ss:$8 sps:$4 sm:$0xff]  }
 0x4d5   : > { %2494 = vmatpush1.bf16.msra.mxu1 %v5530_v23  ;;  %v5641_v23 = vld [vmem:[%s7370_s5 + $0x370] ss:$8 sps:$4 sm:$0xff]  }
 0x4d6   : > { %2495 = vmatprep.subr.bf16.mxu1 %v5535_v24  ;;  %v5649_v24 = vld [vmem:[%s7370_s5 + $0x384] ss:$8 sps:$4 sm:$0xff]  }
 0x4d9   : > { %2496 = vmatpush1.bf16.msra.mxu1 %v5533_v25  ;;  %v5647_v25 = vld [vmem:[%s7370_s5 + $0x380] ss:$8 sps:$4 sm:$0xff]  }
 0x4da   : > { %2497 = vmatprep.subr.bf16.mxu1 %v5538_v26  ;;  %v5652_v26 = vld [vmem:[%s7370_s5 + $0x2b4] ss:$8 sps:$4 sm:$0xff]  }
 0x4dd   : > { %2498 = vmatpush1.bf16.msra.mxu1 %v5536_v27  ;;  %v5655_v27 = vld [vmem:[%s7370_s5 + $0x394] ss:$8 sps:$4 sm:$0xff]  }
 0x4de   : > { %2499 = vmatprep.subr.bf16.mxu1 %v5541_v28  ;;  %v5650_v28 = vld [vmem:[%s7370_s5 + $0x2b0] ss:$8 sps:$4 sm:$0xff]  }
 0x4e1   : > { %2500 = vmatpush1.bf16.msra.mxu1 %v5539_v30  ;;  %v5653_v30 = vld [vmem:[%s7370_s5 + $0x390] ss:$8 sps:$4 sm:$0xff]  }
 0x4e2   : > { %4906 = vmatprep.subr.msk.bf16.mxu1 %vm2146_vm3, %v6643_v59 }
 0x56f   : > { %v2187_v36 = vpop.f32.mrb[28].mxu1 }
 0x570   : > { %v2189_v37 = vpop.f32.mrb[29].mxu1  ;;  %v2194_v41 = vpack.c.bf16 %v2187_v36, %v2187_v36  ;;  %v5661_v36 = vld [vmem:[%s7370_s5 + $0x3a4] ss:$8 sps:$4 sm:$0xff]  }
 0x571   : > { %v2195_v38 = vpack.c.bf16 %v2189_v37, %v2189_v37  ;;  %v2191_v39 = vpop.f32.mrb[30].mxu1  ;;  %v5664_v37 = vld [vmem:[%s7370_s5 + $0x2d4] ss:$8 sps:$4 sm:$0xff]  }
 0x572   : > { %v2192_v43 = vpop.f32.mrb[31].mxu1  ;;  %v5662_v39 = vld [vmem:[%s7370_s5 + $0x2d0] ss:$8 sps:$4 sm:$0xff]  }
 0x573   : > { %2702 = vmatprep.mubr.bf16.mxu0 %v2195_v38  ;;  %v5667_v38 = vld [vmem:[%s7370_s5 + $0x3b4] ss:$8 sps:$4 sm:$0xff]   ;;  %v5670_v43 = vld [vmem:[%s7370_s5 + $0x2e4] ss:$8 sps:$4 sm:$0xff]  }
 0x574   : > { %2703 = vmatmul.mubr.bf16.vlgmr.msra.gmra.mrb[36].mxu0 %v2194_v41  ;;  %v5668_v41 = vld [vmem:[%s7370_s5 + $0x2e0] ss:$8 sps:$4 sm:$0xff]  }
 0x575   : > { %2953 = vmatpush1.bf16.msra.mxu0 %v5590_v40  ;;  %v5665_v40 = vld [vmem:[%s7370_s5 + $0x3b0] ss:$8 sps:$4 sm:$0xff]  }
 0x576   : > { %2954 = vmatprep.subr.bf16.mxu0 %v5595_v44  ;;  %v5671_v44 = vld [vmem:[%s7370_s5 + $0x3c0] ss:$8 sps:$4 sm:$0xff]  }
 0x577   : > { %v2267_v48 = vpop.f32.mrb[32].mxu1 }
 0x578   : > { %v2269_v49 = vpop.f32.mrb[33].mxu1  ;;  %v2274_v52 = vpack.c.bf16 %v2267_v48, %v2267_v48  ;;  %v5679_v48 = vld [vmem:[%s7370_s5 + $0x3d4] ss:$8 sps:$4 sm:$0xff]  }
 0x579   : > { %v2275_v50 = vpack.c.bf16 %v2269_v49, %v2269_v49  ;;  %v2271_v51 = vpop.f32.mrb[34].mxu1  ;;  %2955 = vmatpush1.bf16.msra.mxu0 %v5593_v46  ;;  %v5673_v46 = vld [vmem:[%s7370_s5 + $0x3c4] ss:$8 sps:$4 sm:$0xff]   ;;  %v5674_v49 = vld [vmem:[%s7370_s5 + $0x2f0] ss:$8 sps:$4 sm:$0xff]  }
 0x57a   : > { %v2272_v53 = vpop.f32.mrb[35].mxu1  ;;  %2956 = vmatprep.subr.bf16.mxu0 %v5598_v47  ;;  %v5676_v47 = vld [vmem:[%s7370_s5 + $0x2f4] ss:$8 sps:$4 sm:$0xff]   ;;  %v5682_v51 = vld [vmem:[%s7370_s5 + $0x3e4] ss:$8 sps:$4 sm:$0xff]  }
 0x57b   : > { %2501 = vmatprep.mubr.bf16.mxu1 %v2275_v50  ;;  %v5677_v50 = vld [vmem:[%s7370_s5 + $0x3d0] ss:$8 sps:$4 sm:$0xff]   ;;  %v5685_v53 = vld [vmem:[%s7370_s5 + $0x3f4] ss:$8 sps:$4 sm:$0xff]  }
 0x57c   : > { %2502 = vmatmul.mubr.bf16.vlgmr.msra.gmra.mrb[36].mxu1 %v2274_v52  ;;  %v5680_v52 = vld [vmem:[%s7370_s5 + $0x3e0] ss:$8 sps:$4 sm:$0xff]  }
 0x57d   : > { %2717 = vmatpush1.bf16.msra.mxu1 %v6649_v60  ;;  %2748 = vmatprep.mubr.bf16.mxu1 %v5846_v0 }
 0x57e   : > { %4973 = vmatprep.subr.msk.bf16.mxu1 %vm2146_vm3, %v6643_v59  ;;  %2957 = vmatpush1.bf16.msra.mxu0 %v5596_v55  ;;  %v5608_v59 = vld [vmem:[%s7370_s5 + $0x240] ss:$8 sps:$4 sm:$0xff]   ;;  %v5683_v55 = vld [vmem:[%s7370_s5 + $0x3f0] ss:$8 sps:$4 sm:$0xff]  }
 0x57f   : > { %2958 = vmatprep.subr.bf16.mxu0 %v5604_v56 }
 0x582   : > { %2959 = vmatpush1.bf16.msra.mxu0 %v5602_v57 }
 0x583   : > { %2960 = vmatprep.subr.bf16.mxu0 %v5610_v8 }
 0x584   : > { %4907 = vmatmul.mubr.msk.bf16.vlgmr.msra.gmra.mrb[40].mxu1 %vm2142_vm4, %v4905_v61 }
 0x585   : > { %3001 = vmatpush1.bf16.msra.mxu1 %v6649_v60  ;;  %3032 = vmatprep.mubr.bf16.mxu1 %v5846_v0  ;;  %v5599_v60 = vld [vmem:[%s7370_s5 + $0x300] ss:$8 sps:$4 sm:$0xff]  }
 0x586   : > { %3236 = vmatprep.subr.bf16.mxu1 %v5601_v42  ;;  %2961 = vmatpush1.bf16.msra.mxu0 %v5608_v59 }
 0x587   : > { %2962 = vmatprep.subr.bf16.mxu0 %v5616_v54 }
 0x58a   : > { %2963 = vmatpush1.bf16.msra.mxu0 %v5614_v58 }
 0x58b   : > { %2964 = vmatprep.subr.bf16.mxu0 %v5622_v45 }
 0x58c   : > { %4974 = vmatmul.mubr.msk.bf16.vlgmr.msra.gmra.mrb[44].mxu1 %vm2142_vm4, %v4972_v1 }
 0x58d   : > { %3237 = vmatpush1.bf16.msra.mxu1 %v5599_v60 }
 0x58e   : > { %3238 = vmatprep.subr.bf16.mxu1 %v5607_v2  ;;  %2965 = vmatpush1.bf16.msra.mxu0 %v5620_v4 }
 0x58f   : > { %2966 = vmatprep.subr.bf16.mxu0 %v5628_v5 }
 0x591   : > { %3239 = vmatpush1.bf16.msra.mxu1 %v5605_v7 }
 0x592   : > { %3240 = vmatprep.subr.bf16.mxu1 %v5613_v10  ;;  %2967 = vmatpush1.bf16.msra.mxu0 %v5626_v11 }
 0x593   : > { %2968 = vmatprep.subr.bf16.mxu0 %v5634_v12 }
 0x595   : > { %3241 = vmatpush1.bf16.msra.mxu1 %v5611_v13 }
 0x596   : > { %3242 = vmatprep.subr.bf16.mxu1 %v5619_v14  ;;  %2969 = vmatpush1.bf16.msra.mxu0 %v5632_v62 }
 0x597   : > { %2970 = vmatprep.subr.bf16.mxu0 %v5640_v63 }
 0x599   : > { %3243 = vmatpush1.bf16.msra.mxu1 %v5617_v15 }
 0x59a   : > { %3244 = vmatprep.subr.bf16.mxu1 %v5625_v6  ;;  %2971 = vmatpush1.bf16.msra.mxu0 %v5638_v3 }
 0x59b   : > { %2972 = vmatprep.subr.bf16.mxu0 %v5646_v16 }
 0x59d   : > { %3245 = vmatpush1.bf16.msra.mxu1 %v5623_v17 }
 0x59e   : > { %3246 = vmatprep.subr.bf16.mxu1 %v5631_v9  ;;  %2973 = vmatpush1.bf16.msra.mxu0 %v5644_v18  ;;  %v3279_v18 = vld [vmem:[%s7371_s6] sm:$0x3] }
 0x59f   : > { %2974 = vmatprep.subr.bf16.mxu0 %v5652_v26 }
 0x5a1   : > { %3247 = vmatpush1.bf16.msra.mxu1 %v5629_v19  ;;  %v3284_v19 = vrot.slane %v3279_v18, %v6612_v32 }
 0x5a2   : > { %3248 = vmatprep.subr.bf16.mxu1 %v5637_v20  ;;  %2975 = vmatpush1.bf16.msra.mxu0 %v5650_v28 }
 0x5a3   : > { %2976 = vmatprep.subr.bf16.mxu0 %v5658_v33 }
 0x5a5   : > { %3249 = vmatpush1.bf16.msra.mxu1 %v5635_v21  ;;  %v3288_v21 = vrot.slane %v3279_v18, %v6621_v35  ;;  %v5092_v18 = vld [vmem:[%s7372_s7 + $0x2] sm:$0x1] }
 0x5a6   : > { %3250 = vmatprep.subr.bf16.mxu1 %v5643_v22  ;;  %2977 = vmatpush1.bf16.msra.mxu0 %v5656_v31 }
 0x5a7   : > { %2978 = vmatprep.subr.bf16.mxu0 %v5664_v37 }
 0x5a9   : > { %3251 = vmatpush1.bf16.msra.mxu1 %v5641_v23 }
 0x5aa   : > { %3252 = vmatprep.subr.bf16.mxu1 %v5649_v24  ;;  %2979 = vmatpush1.bf16.msra.mxu0 %v5662_v39 }
 0x5ab   : > { %2980 = vmatprep.subr.bf16.mxu0 %v5670_v43  ;;  %v3297_v43 = vld [vmem:[%s7372_s7] sm:$0x1] }
 0x5ad   : > { %3253 = vmatpush1.bf16.msra.mxu1 %v5647_v25 }
 0x5ae   : > { %3254 = vmatprep.subr.bf16.mxu1 %v5655_v27  ;;  %2981 = vmatpush1.bf16.msra.mxu0 %v5668_v41  ;;  %v5040_v41 = vld [vmem:[%s7372_s7 + $0x1] sm:$0x1] }
 0x5af   : > { %2982 = vmatprep.subr.bf16.mxu0 %v5676_v47  ;;  %v5687_v47 = vld [vmem:[%s7373_s8 + $0x68] sm:$0xff]  }
 0x5b1   : > { %3255 = vmatpush1.bf16.msra.mxu1 %v5653_v30  ;;  %v5847_v30 = vmov 65535  }
 0x5b2   : > { %3256 = vmatprep.subr.bf16.mxu1 %v5661_v36  ;;  %2983 = vmatpush1.bf16.msra.mxu0 %v5674_v49  ;;  %v3303_v31 = vsel %vm3302_vm5, 4294967295, %v5847_v30  ;;  %v5688_v49 = vld [vmem:[%s7373_s8 + $0x70] sm:$0xff]  }
 0x5b3   : > { %v3304_v37 = vsel %vm501_vm0, %v3303_v31, 0  ;;  %v5722_v30 = vld [vmem:[%s7375_s10] ss:$16 sps:$4 sm:$0xff]   ;;  %v5724_v31 = vld [vmem:[%s7375_s10 + $0x4] ss:$16 sps:$4 sm:$0xff]  }
 0x5b5   : > { %3257 = vmatpush1.bf16.msra.mxu1 %v5659_v34 }
 0x5b6   : > { %3258 = vmatprep.subr.bf16.mxu1 %v5667_v38 }
 0x5b9   : > { %3259 = vmatpush1.bf16.msra.mxu1 %v5665_v40 }
 0x5ba   : > { %3260 = vmatprep.subr.bf16.mxu1 %v5673_v46  ;;  %v5698_v46 = vld [vmem:[%s7373_s8] sm:$0xff]  }
 0x5bd   : > { %3261 = vmatpush1.bf16.msra.mxu1 %v5671_v44  ;;  %v5686_v44 = vld [vmem:[%s7373_s8 + $0x60] sm:$0xff]  }
 0x5be   : > { %3262 = vmatprep.subr.bf16.mxu1 %v5679_v48  ;;  %v5699_v48 = vld [vmem:[%s7373_s8 + $0x8] sm:$0xff]  }
 0x5c1   : > { %3263 = vmatpush1.bf16.msra.mxu1 %v5677_v50  ;;  %v5700_v50 = vld [vmem:[%s7373_s8 + $0x10] sm:$0xff]  }
 0x5c2   : > { %3264 = vmatprep.subr.bf16.mxu1 %v5682_v51  ;;  %v5689_v51 = vld [vmem:[%s7373_s8 + $0x78] sm:$0xff]  }
 0x5c5   : > { %3265 = vmatpush1.bf16.msra.mxu1 %v5680_v52  ;;  %v5701_v52 = vld [vmem:[%s7373_s8 + $0x18] sm:$0xff]  }
 0x5c6   : > { %3266 = vmatprep.subr.bf16.mxu1 %v5685_v53  ;;  %v5690_v53 = vld [vmem:[%s7373_s8 + $0x80] sm:$0xff]  }
 0x5c9   : > { %3267 = vmatpush1.bf16.msra.mxu1 %v5683_v55  ;;  %v5702_v55 = vld [vmem:[%s7373_s8 + $0x20] sm:$0xff]  }
 0x647   : > { %v2704_v56 = vpop.f32.mrb[36].mxu0 }
 0x648   : > { %v2706_v57 = vpop.f32.mrb[37].mxu0 }
 0x649   : > { %v2708_v8 = vpop.f32.mrb[38].mxu0 }
 0x64a   : > { %v2709_v61 = vpop.f32.mrb[39].mxu0  ;;  %v5692_v8 = vld [vmem:[%s7373_s8 + $0x90] sm:$0xff]  }
 0x64b   : > { %v5704_v61 = vld [vmem:[%s7373_s8 + $0x30] sm:$0xff]  }
 0x64f   : > { %v2503_v42 = vpop.f32.mrb[36].mxu1 }
 0x650   : > { %v2705_v59 = vadd.f32 %v2704_v56, %v2503_v42  ;;  %v2505_v54 = vpop.f32.mrb[37].mxu1  ;;  %v5691_v56 = vld [vmem:[%s7373_s8 + $0x88] sm:$0xff]   ;;  %v5693_v42 = vld [vmem:[%s7373_s8 + $0x98] sm:$0xff]  }
 0x651   : > { %v2707_v58 = vadd.f32 %v2706_v57, %v2505_v54  ;;  %v2507_v45 = vpop.f32.mrb[38].mxu1  ;;  %v5703_v57 = vld [vmem:[%s7373_s8 + $0x28] sm:$0xff]   ;;  %v5694_v54 = vld [vmem:[%s7373_s8 + $0xa0] sm:$0xff]  }
 0x652   : > { %v2508_v1 = vpop.f32.mrb[39].mxu1  ;;  %v5695_v45 = vld [vmem:[%s7373_s8 + $0xa8] sm:$0xff]  }
 0x653   : > { %v5707_v1 = vld [vmem:[%s7373_s8 + $0x48] sm:$0xff]  }
 0x657   : > { %v2750_v60 = vpop.f32.mrb[40].mxu1 }
 0x658   : > { %v2752_v2 = vpop.f32.mrb[41].mxu1  ;;  %v2757_v7 = vpack.c.bf16 %v2750_v60, %v2750_v60  ;;  %v5696_v60 = vld [vmem:[%s7373_s8 + $0xb0] sm:$0xff]  }
 0x659   : > { %v2758_v4 = vpack.c.bf16 %v2752_v2, %v2752_v2  ;;  %v2754_v5 = vpop.f32.mrb[42].mxu1  ;;  %v5697_v2 = vld [vmem:[%s7373_s8 + $0xb8] sm:$0xff]  }
 0x65a   : > { %v2755_v10 = vpop.f32.mrb[43].mxu1  ;;  %v5709_v5 = vld [vmem:[%s7373_s8 + $0x58] sm:$0xff]  }
 0x65b   : > { %2984 = vmatprep.mubr.bf16.mxu0 %v2758_v4  ;;  %v5708_v4 = vld [vmem:[%s7373_s8 + $0x50] sm:$0xff]  }
 0x65c   : > { %2985 = vmatmul.mubr.bf16.vlgmr.msra.gmra.mrb[40].mxu0 %v2757_v7 }
 0x65d   : > { %3415 = vmatprep.mubr.bf16.mxu0 %v5846_v0 }
 0x65f   : > { %v3034_v11 = vpop.f32.mrb[44].mxu1 }
 0x660   : > { %v3036_v12 = vpop.f32.mrb[45].mxu1  ;;  %v3041_v62 = vpack.c.bf16 %v3034_v11, %v3034_v11 }
 0x661   : > { %v3042_v13 = vpack.c.bf16 %v3036_v12, %v3036_v12  ;;  %v3038_v14 = vpop.f32.mrb[46].mxu1 }
 0x662   : > { %v3039_v63 = vpop.f32.mrb[47].mxu1 }
 0x663   : > { %3268 = vmatprep.mubr.bf16.mxu1 %v3042_v13 }
 0x664   : > { %3269 = vmatmul.mubr.bf16.vlgmr.msra.gmra.mrb[48].mxu1 %v3041_v62 }
 0x665   : > { %3343 = vmatprep.mubr.bf16.mxu1 %v5846_v0 }
 0x72f   : > { %v2986_v15 = vpop.f32.mrb[40].mxu0 }
 0x730   : > { %v2993_v6 = vadd.f32 %v2986_v15, %v2705_v59  ;;  %v2988_v3 = vpop.f32.mrb[41].mxu0  ;;  %v5705_v59 = vld [vmem:[%s7373_s8 + $0x38] sm:$0xff]  }
 0x731   : > { %v2994_v16 = vadd.f32 %v2988_v3, %v2707_v58  ;;  %v2990_v17 = vpop.f32.mrb[42].mxu0  ;;  %v5706_v58 = vld [vmem:[%s7373_s8 + $0x40] sm:$0xff]  }
 0x732   : > { %v2991_v9 = vpop.f32.mrb[43].mxu0  ;;  %v5710_v17 = vld [vmem:[%s7373_s8 + $0xc0] sm:$0xff]  }
 0x733   : > { %v5711_v9 = vld [vmem:[%s7373_s8 + $0xc8] sm:$0xff]  }
 0x737   : > { %v3270_v20 = vpop.f32.mrb[48].mxu1 }
 0x738   : > { %v3277_v22 = vadd.f32 %v3270_v20, %v2993_v6  ;;  %v3272_v23 = vpop.f32.mrb[49].mxu1  ;;  %v5713_v20 = vld [vmem:[%s7373_s8 + $0xd8] sm:$0xff]  }
 0x739   : > { %v3278_v24 = vadd.f32 %v3272_v23, %v2994_v16  ;;  %v3274_v25 = vpop.f32.mrb[50].mxu1  ;;  %v5716_v23 = vld [vmem:[%s7373_s8 + $0xf0] sm:$0xff]  }
 0x73a   : > { %v3291_v26 = vadd.f32 %v3284_v19, %v3277_v22  ;;  %v3275_v27 = vpop.f32.mrb[51].mxu1  ;;  %v5712_v19 = vld [vmem:[%s7373_s8 + $0xd0] sm:$0xff]   ;;  %v5715_v22 = vld [vmem:[%s7373_s8 + $0xe8] sm:$0xff]   ;;  %v5718_v25 = vld [vmem:[%s7373_s8 + $0x100] sm:$0xff]  }
 0x73b   : > { %v3292_v28 = vadd.f32 %v3288_v21, %v3278_v24  ;;  %v5714_v21 = vld [vmem:[%s7373_s8 + $0xe0] sm:$0xff]   ;;  %v5717_v24 = vld [vmem:[%s7373_s8 + $0xf8] sm:$0xff]   ;;  %v5720_v27 = vld [vmem:[%s7373_s8 + $0x110] sm:$0xff]  }
 0x73c   : > { %v3293_v33 = vmax.f32 %v3291_v26, 0.0  ;;  %v5719_v26 = vld [vmem:[%s7373_s8 + $0x108] sm:$0xff]  }
 0x73d   : > { %v3294_v34 = vmax.f32 %v3292_v28, 0.0  ;;  %v5721_v28 = vld [vmem:[%s7373_s8 + $0x118] sm:$0xff]  }
 0x73e   : > { %v3295_v36 = vpack.c.bf16 %v3293_v33, %v3293_v33  ;;  %v5727_v33 = vld [vmem:[%s7375_s10 + $0x24] ss:$16 sps:$4 sm:$0xff]  }
 0x73f   : > { %v3296_v38 = vpack.c.bf16 %v3294_v34, %v3294_v34  ;;  %v5725_v34 = vld [vmem:[%s7375_s10 + $0x20] ss:$16 sps:$4 sm:$0xff]  }
 0x740   : > { %v6989_v40 = vand.u32 %v3304_v37, %v3295_v36 }
 0x741   : > { %v6987_v39 = vand.u32 %v3304_v37, %v3296_v38 }
 0x743   : > { %3311 = vmatprep.subr.bf16.mxu1 %v6987_v39  ;;  %3383 = vmatprep.subr.bf16.mxu0 %v6987_v39 }
 0x744   : > { %3312 = vmatpush1.bf16.msra.mxu1 %v6989_v40  ;;  %3384 = vmatpush1.bf16.msra.mxu0 %v6989_v40 }
 0x745   : > { %3527 = vmatprep.subr.bf16.mxu1 %v5846_v0  ;;  %3642 = vmatprep.subr.bf16.mxu0 %v5846_v0 }
 0x747   : > { %5041 = vmatmul.mubr.msk.bf16.vlgmr.msra.gmra.mrb[44].mxu0 %vm3298_vm6, %v5040_v41  ;;  %5039 = vmatmul.mubr.msk.bf16.vlgmr.msra.gmra.mrb[52].mxu1 %vm3298_vm6, %v3297_v43 }
 0x748   : > { %3528 = vmatpush1.bf16.msra.mxu1 %v5686_v44  ;;  %3643 = vmatpush1.bf16.msra.mxu0 %v5698_v46 }
 0x749   : > { %3529 = vmatprep.subr.bf16.mxu1 %v5846_v0  ;;  %3644 = vmatprep.subr.bf16.mxu0 %v5846_v0 }
 0x74c   : > { %3530 = vmatpush1.bf16.msra.mxu1 %v5687_v47  ;;  %3645 = vmatpush1.bf16.msra.mxu0 %v5699_v48 }
 0x74d   : > { %3531 = vmatprep.subr.bf16.mxu1 %v5846_v0  ;;  %3646 = vmatprep.subr.bf16.mxu0 %v5846_v0 }
 0x750   : > { %3532 = vmatpush1.bf16.msra.mxu1 %v5688_v49  ;;  %3647 = vmatpush1.bf16.msra.mxu0 %v5700_v50 }
 0x751   : > { %3533 = vmatprep.subr.bf16.mxu1 %v5846_v0  ;;  %3648 = vmatprep.subr.bf16.mxu0 %v5846_v0 }
 0x754   : > { %3534 = vmatpush1.bf16.msra.mxu1 %v5689_v51  ;;  %3649 = vmatpush1.bf16.msra.mxu0 %v5701_v52 }
 0x755   : > { %3535 = vmatprep.subr.bf16.mxu1 %v5846_v0  ;;  %3650 = vmatprep.subr.bf16.mxu0 %v5846_v0 }
 0x758   : > { %3536 = vmatpush1.bf16.msra.mxu1 %v5690_v53  ;;  %3651 = vmatpush1.bf16.msra.mxu0 %v5702_v55  ;;  %v5730_v53 = vld [vmem:[%s7375_s10 + $0x44] ss:$16 sps:$4 sm:$0xff]   ;;  %v5728_v55 = vld [vmem:[%s7375_s10 + $0x40] ss:$16 sps:$4 sm:$0xff]  }
 0x759   : > { %3537 = vmatprep.subr.bf16.mxu1 %v5846_v0  ;;  %3652 = vmatprep.subr.bf16.mxu0 %v5846_v0 }
 0x75c   : > { %3538 = vmatpush1.bf16.msra.mxu1 %v5691_v56  ;;  %3653 = vmatpush1.bf16.msra.mxu0 %v5703_v57  ;;  %v5733_v56 = vld [vmem:[%s7375_s10 + $0x64] ss:$16 sps:$4 sm:$0xff]   ;;  %v5731_v57 = vld [vmem:[%s7375_s10 + $0x60] ss:$16 sps:$4 sm:$0xff]  }
 0x75d   : > { %3539 = vmatprep.subr.bf16.mxu1 %v5846_v0  ;;  %3654 = vmatprep.subr.bf16.mxu0 %v5846_v0 }
 0x760   : > { %3540 = vmatpush1.bf16.msra.mxu1 %v5692_v8  ;;  %3655 = vmatpush1.bf16.msra.mxu0 %v5704_v61  ;;  %v5736_v8 = vld [vmem:[%s7375_s10 + $0xc] ss:$16 sps:$4 sm:$0xff]   ;;  %v5754_v61 = vld [vmem:[%s7377_s12 + $0xc0] sm:$0xff]  }
 0x761   : > { %3541 = vmatprep.subr.bf16.mxu1 %v5846_v0  ;;  %3656 = vmatprep.subr.bf16.mxu0 %v5846_v0 }
 0x764   : > { %3542 = vmatpush1.bf16.msra.mxu1 %v5693_v42  ;;  %3657 = vmatpush1.bf16.msra.mxu0 %v5705_v59  ;;  %v5756_v42 = vld [vmem:[%s7377_s12 + $0x80] sm:$0xff]   ;;  %v5758_v59 = vld [vmem:[%s7377_s12 + $0xc8] sm:$0xff]  }
 0x765   : > { %3543 = vmatprep.subr.bf16.mxu1 %v5846_v0  ;;  %3658 = vmatprep.subr.bf16.mxu0 %v5846_v0 }
 0x768   : > { %3544 = vmatpush1.bf16.msra.mxu1 %v5694_v54  ;;  %3659 = vmatpush1.bf16.msra.mxu0 %v5706_v58  ;;  %v5760_v54 = vld [vmem:[%s7377_s12 + $0x88] sm:$0xff]  }
 0x769   : > { %3545 = vmatprep.subr.bf16.mxu1 %v5846_v0  ;;  %3660 = vmatprep.subr.bf16.mxu0 %v5846_v0 }
 0x76c   : > { %3546 = vmatpush1.bf16.msra.mxu1 %v5695_v45  ;;  %3661 = vmatpush1.bf16.msra.mxu0 %v5707_v1  ;;  %v3871_v45 = vld [vmem:[%s7374_s9] sm:$0x1] }
 0x76d   : > { %3547 = vmatprep.subr.bf16.mxu1 %v5846_v0  ;;  %3662 = vmatprep.subr.bf16.mxu0 %v5846_v0 }
 0x770   : > { %3548 = vmatpush1.bf16.msra.mxu1 %v5696_v60  ;;  %3663 = vmatpush1.bf16.msra.mxu0 %v5708_v4 }
 0x771   : > { %3549 = vmatprep.subr.bf16.mxu1 %v5846_v0  ;;  %3664 = vmatprep.subr.bf16.mxu0 %v5846_v0 }
 0x774   : > { %3550 = vmatpush1.bf16.msra.mxu1 %v5697_v2  ;;  %3665 = vmatpush1.bf16.msra.mxu0 %v5709_v5 }
 0x775   : > { %3687 = vmatprep.subr.bf16.mxu1 %v6987_v39  ;;  %3830 = vmatprep.subr.bf16.mxu0 %v5846_v0 }
 0x81a   : > { %v3417_v7 = vpop.f32.mrb[44].mxu0  ;;  %v3345_v10 = vpop.f32.mrb[52].mxu1 }
 0x81b   : > { %v3419_v11 = vpop.f32.mrb[45].mxu0  ;;  %v3352_v12 = vpack.c.bf16 %v3345_v10, %v3345_v10  ;;  %v3347_v13 = vpop.f32.mrb[53].mxu1  ;;  %v3424_v6 = vpack.c.bf16 %v3417_v7, %v3417_v7  ;;  %v5734_v10 = vld [vmem:[%s7375_s10 + $0x8] ss:$16 sps:$4 sm:$0xff]  }
 0x81c   : > { %v3425_v14 = vpack.c.bf16 %v3419_v11, %v3419_v11  ;;  %v3353_v62 = vpack.c.bf16 %v3347_v13, %v3347_v13  ;;  %v3421_v63 = vpop.f32.mrb[46].mxu0  ;;  %v3349_v15 = vpop.f32.mrb[54].mxu1  ;;  %v5737_v13 = vld [vmem:[%s7375_s10 + $0x28] ss:$16 sps:$4 sm:$0xff]  }
 0x81d   : > { %v3422_v3 = vpop.f32.mrb[47].mxu0  ;;  %v3350_v16 = vpop.f32.mrb[55].mxu1  ;;  %v5745_v63 = vld [vmem:[%s7375_s10 + $0x6c] ss:$16 sps:$4 sm:$0xff]   ;;  %v5746_v15 = vld [vmem:[%s7377_s12 + $0x40] sm:$0xff]  }
 0x81e   : > { %5078 = vmatprep.mubr.msk.bf16.mxu1 %vm3523_vm7, %v3425_v14  ;;  %5091 = vmatprep.mubr.msk.bf16.mxu0 %vm3523_vm7, %v3353_v62  ;;  %v5742_v14 = vld [vmem:[%s7375_s10 + $0x4c] ss:$16 sps:$4 sm:$0xff]   ;;  %v5740_v62 = vld [vmem:[%s7375_s10 + $0x48] ss:$16 sps:$4 sm:$0xff]  }
 0x81f   : > { %3560 = vmatmul.mubr.bf16.vlgmr.msra.gmra.mrb[56].mxu1 %v3424_v6  ;;  %3675 = vmatmul.mubr.bf16.vlgmr.msra.gmra.mrb[48].mxu0 %v3352_v12  ;;  %v5739_v12 = vld [vmem:[%s7375_s10 + $0x2c] ss:$16 sps:$4 sm:$0xff]   ;;  %v5747_v6 = vld [vmem:[%s7377_s12] sm:$0xff]  }
 0x820   : > { %3688 = vmatpush1.bf16.msra.mxu1 %v6989_v40  ;;  %3719 = vmatprep.mubr.bf16.mxu1 %v5846_v0  ;;  %v5748_v3 = vld [vmem:[%s7377_s12 + $0x48] sm:$0xff]  }
 0x821   : > { %3831 = vmatpush1.bf16.msra.mxu0 %v5710_v17  ;;  %3996 = vmatprep.subr.bf16.mxu1 %v5724_v31  ;;  %v5749_v16 = vld [vmem:[%s7377_s12 + $0x8] sm:$0xff]   ;;  %v5750_v17 = vld [vmem:[%s7377_s12 + $0x50] sm:$0xff]   ;;  %v5768_v31 = vld [vmem:[%s7377_s12 + $0x98] sm:$0xff]  }
 0x822   : > { %3832 = vmatprep.subr.bf16.mxu0 %v5846_v0 }
 0x825   : > { %3833 = vmatpush1.bf16.msra.mxu0 %v5711_v9  ;;  %v5751_v9 = vld [vmem:[%s7377_s12 + $0x10] sm:$0xff]  }
 0x826   : > { %3834 = vmatprep.subr.bf16.mxu0 %v5846_v0 }
 0x827   : > { %5093 = vmatmul.mubr.msk.bf16.vlgmr.msra.gmra.mrb[60].mxu1 %vm3298_vm6, %v5092_v18  ;;  %v5752_v18 = vld [vmem:[%s7377_s12 + $0x58] sm:$0xff]  }
 0x828   : > { %4028 = vmatprep.mubr.bf16.mxu1 %v5846_v0  ;;  %3997 = vmatpush1.bf16.msra.mxu1 %v5722_v30  ;;  %v5767_v30 = vld [vmem:[%s7377_s12 + $0x78] sm:$0xff]  }
 0x829   : > { %3835 = vmatpush1.bf16.msra.mxu0 %v5712_v19  ;;  %3998 = vmatprep.subr.bf16.mxu1 %v5727_v33  ;;  %v5753_v19 = vld [vmem:[%s7377_s12 + $0x18] sm:$0xff]  }
 0x82a   : > { %3836 = vmatprep.subr.bf16.mxu0 %v5846_v0  ;;  %v5769_v33 = vld [vmem:[%s7377_s12 + $0x38] sm:$0xff]  }
 0x82c   : > { %3999 = vmatpush1.bf16.msra.mxu1 %v5725_v34  ;;  %v5770_v34 = vld [vmem:[%s7377_s12 + $0xe0] sm:$0xff]  }
 0x82d   : > { %3837 = vmatpush1.bf16.msra.mxu0 %v5713_v20  ;;  %4000 = vmatprep.subr.bf16.mxu1 %v5730_v53  ;;  %v5755_v20 = vld [vmem:[%s7377_s12 + $0x60] sm:$0xff]  }
 0x82e   : > { %3838 = vmatprep.subr.bf16.mxu0 %v5846_v0 }
 0x830   : > { %4001 = vmatpush1.bf16.msra.mxu1 %v5728_v55 }
 0x831   : > { %3839 = vmatpush1.bf16.msra.mxu0 %v5714_v21  ;;  %4002 = vmatprep.subr.bf16.mxu1 %v5733_v56  ;;  %v5757_v21 = vld [vmem:[%s7377_s12 + $0x20] sm:$0xff]  }
 0x832   : > { %3840 = vmatprep.subr.bf16.mxu0 %v5846_v0 }
 0x834   : > { %4003 = vmatpush1.bf16.msra.mxu1 %v5731_v57 }
 0x835   : > { %3841 = vmatpush1.bf16.msra.mxu0 %v5715_v22  ;;  %4037 = vmatprep.subr.bf16.mxu1 %v5736_v8  ;;  %v5759_v22 = vld [vmem:[%s7377_s12 + $0x68] sm:$0xff]  }
 0x836   : > { %3842 = vmatprep.subr.bf16.mxu0 %v5846_v0 }
 0x839   : > { %3843 = vmatpush1.bf16.msra.mxu0 %v5716_v23  ;;  %v5761_v23 = vld [vmem:[%s7377_s12 + $0x28] sm:$0xff]  }
 0x83a   : > { %3844 = vmatprep.subr.bf16.mxu0 %v5846_v0 }
 0x83d   : > { %3845 = vmatpush1.bf16.msra.mxu0 %v5717_v24  ;;  %v5762_v24 = vld [vmem:[%s7377_s12 + $0xd0] sm:$0xff]  }
 0x83e   : > { %3846 = vmatprep.subr.bf16.mxu0 %v5846_v0 }
 0x841   : > { %3847 = vmatpush1.bf16.msra.mxu0 %v5718_v25  ;;  %v5763_v25 = vld [vmem:[%s7377_s12 + $0x70] sm:$0xff]  }
 0x842   : > { %3848 = vmatprep.subr.bf16.mxu0 %v5846_v0 }
 0x845   : > { %3849 = vmatpush1.bf16.msra.mxu0 %v5719_v26  ;;  %v5764_v26 = vld [vmem:[%s7377_s12 + $0x90] sm:$0xff]  }
 0x846   : > { %3850 = vmatprep.subr.bf16.mxu0 %v5846_v0 }
 0x849   : > { %3851 = vmatpush1.bf16.msra.mxu0 %v5720_v27  ;;  %v5765_v27 = vld [vmem:[%s7377_s12 + $0x30] sm:$0xff]  }
 0x84a   : > { %3852 = vmatprep.subr.bf16.mxu0 %v5846_v0 }
 0x84d   : > { %3853 = vmatpush1.bf16.msra.mxu0 %v5721_v28  ;;  %v5766_v28 = vld [vmem:[%s7377_s12 + $0xd8] sm:$0xff]  }
 0x84e   : > { %5206 = vmatprep.subr.bf16.mxu0 %v5754_v61  ;;  %v3983_v61 = vsub.s32 2, %v6603_v29 }
 0x8f2   : > { %v3561_v36 = vpop.f32.mrb[56].mxu1  ;;  %v3676_v37 = vpop.f32.mrb[48].mxu0 }
 0x8f3   : > { %v3563_v38 = vpop.f32.mrb[57].mxu1  ;;  %v3677_v39 = vadd.f32 %v3676_v37, %v3561_v36  ;;  %v3678_v40 = vpop.f32.mrb[49].mxu0  ;;  %v5771_v36 = vld [vmem:[%s7377_s12 + $0xa0] sm:$0xff]   ;;  %v5772_v37 = vld [vmem:[%s7377_s12 + $0xe8] sm:$0xff]  }
 0x8f4   : > { %v3564_v41 = vpop.f32.mrb[58].mxu1  ;;  %v3679_v43 = vpop.f32.mrb[50].mxu0  ;;  %v5773_v38 = vld [vmem:[%s7377_s12 + $0xa8] sm:$0xff]   ;;  %v5775_v40 = vld [vmem:[%s7377_s12 + $0xb0] sm:$0xff]  }
 0x8f5   : > { %v3565_v44 = vpop.f32.mrb[59].mxu1  ;;  %v3680_v46 = vpop.f32.mrb[51].mxu0  ;;  %v5776_v41 = vld [vmem:[%s7377_s12 + $0xf8] sm:$0xff]  }
 0x8f6   : > { %v5777_v43 = vld [vmem:[%s7377_s12 + $0xb8] sm:$0xff]   ;;  %v3891_v44 = vld [vmem:[%s7376_s11] sm:$0xf] }
 0x8f7   : > { %v3976_v46 = vrot.slane %v3891_v44, %v6612_v32 }
 0x8fa   : > { %v3721_v47 = vpop.f32.mrb[60].mxu1 }
 0x8fb   : > { %v3723_v48 = vpop.f32.mrb[61].mxu1  ;;  %v3728_v51 = vpack.c.bf16 %v3721_v47, %v3721_v47  ;;  %v3980_v47 = vrot.slane %v3891_v44, %v6621_v35 }
 0x8fc   : > { %v3729_v49 = vpack.c.bf16 %v3723_v48, %v3723_v48  ;;  %v3725_v50 = vpop.f32.mrb[62].mxu1 }
 0x8fd   : > { %v3726_v52 = vpop.f32.mrb[63].mxu1 }
 0x8fe   : > { %5130 = vmatprep.mubr.msk.bf16.mxu0 %vm3523_vm7, %v3729_v49 }
 0x8ff   : > { %3863 = vmatmul.mubr.bf16.vlgmr.msra.gmra.mrb[52].mxu0 %v3728_v51 }
 0x900   : > { %5207 = vmatpush3.bf16.msra.mxu0 %v5756_v42  ;;  %v3987_v42 = vsub.s32 3, %v6603_v29 }
 0x901   : > { %5208 = vmatprep.subr.bf16.mxu0 %v5758_v59  ;;  %v3984_v59 = vrot.slane %v3891_v44, %v3983_v61 }
 0x902   : > { %v3988_v32 = vrot.slane %v3891_v44, %v3987_v42 }
 0x904   : > { %5209 = vmatpush3.bf16.msra.mxu0 %v5760_v54 }
 0x905   : > { %5210 = vmatprep.subr.bf16.mxu0 %v5762_v24 }
 0x908   : > { %5211 = vmatpush3.bf16.msra.mxu0 %v5764_v26 }
 0x909   : > { %5212 = vmatprep.subr.bf16.mxu0 %v5766_v28 }
 0x90c   : > { %5213 = vmatpush3.bf16.msra.mxu0 %v5768_v31 }
 0x90d   : > { %5214 = vmatprep.subr.bf16.mxu0 %v5770_v34 }
 0x910   : > { %5215 = vmatpush3.bf16.msra.mxu0 %v5771_v36 }
 0x911   : > { %5216 = vmatprep.subr.bf16.mxu0 %v5772_v37 }
 0x914   : > { %5217 = vmatpush3.bf16.msra.mxu0 %v5773_v38 }
 0x9d2   : > { %v3864_v58 = vpop.f32.mrb[52].mxu0 }
 0x9d3   : > { %v3870_v1 = vadd.f32 %v3864_v58, %v3677_v39  ;;  %v3866_v60 = vpop.f32.mrb[53].mxu0  ;;  %v5774_v39 = vld [vmem:[%s7377_s12 + $0xf0] sm:$0xff]  }
 0x9d4   : > { %v3867_v2 = vpop.f32.mrb[54].mxu0  ;;  %5218 = vmatprep.subr.bf16.mxu0 %v5774_v39 }
 0x9d5   : > { %v3872_v4 = vadd.f32 %v3871_v45, %v3870_v1  ;;  %v3868_v5 = vpop.f32.mrb[55].mxu0  ;;  %5219 = vmatpush3.bf16.msra.mxu0 %v5775_v40 }
 0x9d6   : > { %5220 = vmatprep.subr.bf16.mxu0 %v5776_v41 }
 0x9d7   : > { %v3873_v7 = vmax.f32 %v3872_v4, 0.0 }
 0x9d9   : > { %v3874_v11 = vpack.c.bf16 %v3873_v7, %v3873_v7  ;;  %5221 = vmatpush3.bf16.msra.mxu0 %v5777_v43 }
 0x9db   : > { %5147 = vmatmul.mubr.msk.bf16.vlgmr.msra.gmra.mrb[64].mxu1 %vm3523_vm7, %v3874_v11 }
 0x9dc   : > { %4038 = vmatpush1.bf16.msra.mxu1 %v5734_v10  ;;  %4069 = vmatprep.mubr.bf16.mxu1 %v5846_v0  ;;  %v5743_v0 = vld [vmem:[%s7375_s10 + $0x68] ss:$16 sps:$4 sm:$0xff]  }
 0x9dd   : > { %4039 = vmatprep.subr.bf16.mxu1 %v5739_v12 }
 0x9e0   : > { %4040 = vmatpush1.bf16.msra.mxu1 %v5737_v13 }
 0x9e1   : > { %4041 = vmatprep.subr.bf16.mxu1 %v5742_v14  ;;  %v4150_v14 = vld [vmem:[%s7378_s13] sm:$0x1] }
 0x9e4   : > { %4042 = vmatpush1.bf16.msra.mxu1 %v5740_v62 }
 0x9e5   : > { %4043 = vmatprep.subr.bf16.mxu1 %v5745_v63 }
 0x9e8   : > { %4044 = vmatpush1.bf16.msra.mxu1 %v5743_v0 }
 0x9e9   : > { %5184 = vmatprep.subr.bf16.mxu1 %v5746_v15 }
 0x9eb   : > { %5148 = vmatmul.mubr.msk.bf16.vlgmr.msra.gmra.mrb[68].mxu1 %vm3523_vm7, %v3874_v11 }
 0x9ec   : > { %5185 = vmatpush3.bf16.msra.mxu1 %v5747_v6 }
 0x9ed   : > { %5186 = vmatprep.subr.bf16.mxu1 %v5748_v3 }
 0x9f0   : > { %5187 = vmatpush3.bf16.msra.mxu1 %v5749_v16 }
 0x9f1   : > { %5188 = vmatprep.subr.bf16.mxu1 %v5750_v17 }
 0x9f4   : > { %5189 = vmatpush3.bf16.msra.mxu1 %v5751_v9 }
 0x9f5   : > { %5190 = vmatprep.subr.bf16.mxu1 %v5752_v18 }
 0x9f8   : > { %5191 = vmatpush3.bf16.msra.mxu1 %v5753_v19 }
 0x9f9   : > { %5192 = vmatprep.subr.bf16.mxu1 %v5755_v20 }
 0x9fc   : > { %5193 = vmatpush3.bf16.msra.mxu1 %v5757_v21 }
 0x9fd   : > { %5194 = vmatprep.subr.bf16.mxu1 %v5759_v22 }
 0xa00   : > { %5195 = vmatpush3.bf16.msra.mxu1 %v5761_v23 }
 0xa01   : > { %5196 = vmatprep.subr.bf16.mxu1 %v5763_v25 }
 0xa04   : > { %5197 = vmatpush3.bf16.msra.mxu1 %v5765_v27 }
 0xa05   : > { %5198 = vmatprep.subr.bf16.mxu1 %v5767_v30 }
 0xa08   : > { %5199 = vmatpush3.bf16.msra.mxu1 %v5769_v33 }
 0xaae   : > { %v4030_v48 = vpop.f32.mrb[64].mxu1 }
 0xaaf   : > { %v4031_v49 = vadd.f32 %v4030_v48, %v3976_v46  ;;  %v4032_v50 = vpop.f32.mrb[65].mxu1 }
 0xab0   : > { %v4033_v51 = vadd.f32 %v4032_v50, %v3980_v47  ;;  %v4034_v52 = vpop.f32.mrb[66].mxu1 }
 0xab1   : > { %v4078_v53 = vmax.f32 %v4031_v49, 0.0  ;;  %v4035_v55 = vpop.f32.mrb[67].mxu1 }
 0xab2   : > { %v4079_v56 = vmax.f32 %v4033_v51, 0.0 }
 0xab3   : > { %v4082_v8 = vpack.c.bf16 %v4078_v53, %v4078_v53 }
 0xab4   : > { %v4083_v57 = vpack.c.bf16 %v4079_v56, %v4079_v56 }
 0xab6   : > { %4375 = vmatprep.mubr.bf16.mxu1 %v4083_v57 }
 0xab7   : > { %4376 = vmatmul.mubr.bf16.vlgmr.msra.gmra.mrb[72].mxu1 %v4082_v8 }
 0xabe   : > { %v4071_v54 = vpop.f32.mrb[68].mxu1 }
 0xabf   : > { %v4072_v35 = vadd.f32 %v4071_v54, %v3984_v59  ;;  %v4073_v58 = vpop.f32.mrb[69].mxu1 }
 0xac0   : > { %v4074_v45 = vadd.f32 %v4073_v58, %v3988_v32  ;;  %v4075_v1 = vpop.f32.mrb[70].mxu1 }
 0xac1   : > { %v4080_v60 = vmax.f32 %v4072_v35, 0.0  ;;  %v4076_v2 = vpop.f32.mrb[71].mxu1 }
 0xac2   : > { %v4081_v4 = vmax.f32 %v4074_v45, 0.0 }
 0xac3   : > { %v4084_v7 = vpack.c.bf16 %v4080_v60, %v4080_v60 }
 0xac4   : > { %v4085_v5 = vpack.c.bf16 %v4081_v4, %v4081_v4 }
 0xac6   : > { %4415 = vmatprep.mubr.bf16.mxu0 %v4085_v5 }
 0xac7   : > { %4416 = vmatmul.mubr.bf16.vlgmr.msra.gmra.mrb[56].mxu0 %v4084_v7 }
 0xb8a   : > { %v5200_v10 = vpop.f32.mrb[72].mxu1 }
 0xb8b   : > { %v5201_v11 = vpop.f32.mrb[73].mxu1 }
 0xb8c   : > { %v5202_v12 = vadd.f32 %v5201_v11, %v5200_v10  ;;  %v5203_v29 = vpop.f32.mrb[74].mxu1 }
 0xb8d   : > { %v5204_v13 = vpop.f32.mrb[75].mxu1 }
 0xb8e   : > { %v4378_v0 = vadd.f32 %v5202_v12, %v4150_v14 }
 0xb9a   : > { %v5222_v62 = vpop.f32.mrb[56].mxu0 }
 0xb9b   : > { %v5223_v63 = vpop.f32.mrb[57].mxu0 }
 0xb9c   : > { %v5224_v15 = vadd.f32 %v5223_v63, %v5222_v62  ;;  %v5225_v6 = vpop.f32.mrb[58].mxu0 }
 0xb9d   : > { %v5226_v3 = vpop.f32.mrb[59].mxu0 }
 0xb9e   : > { %v4418_v16 = vadd.f32 %v5224_v15, %v4378_v0 }
 0xba0   : > { %4423 = vst [vmem:[%s459_s19] sm:$0x1] %v4418_v16 }
 0xba1   : > { %5795 = shalt.err (!%p5792_p3)
}
 0xba2   : > { %s5796_s25 = scalar_lea.hbm %s7323_s20, 16  ;;  %s5800_s18 = scalar_lea.hbm %s7379_s14, 32 }
 0xba3   : > { %p5797_p4 = scmp.ne.s32.totalorder %s7323_s20, %s5796_s25  ;;  %p5801_p9 = scmp.lt.u32.totalorder %s7323_s20, %s7379_s14 }
 0xba4   : > { %p5802_p10 = scmp.lt.u32.totalorder %s5800_s18, %s5796_s25  ;;  %p5804_p12 = scmp.lt.u32.totalorder %s5796_s25, %s7323_s20 }
 0xba5   : > { %p5798_p7 = pnand %p5797_p4, %p5962_p5 }
 0xba6   : > { %p5803_p11 = por %p5802_p10, %p5801_p9 }
 0xba7   : > { %p5799_p8 = pneg %p5798_p7 }
 0xba8   : > { %p5805_p13 = por %p5804_p12, %p5803_p11 }
 0xbaa   : > { %p5806_p0 = pnand %p5805_p13, %p5799_p8 }
 0xbac   : > { %5809 = shalt.err (!%p5806_p0)
}
 0xbad   : > { %5229 = dma.vmem_to_hbm [thread:$0]  (%p5962_p5), %s7325_s28, 16, %s7323_s20, %s4425_s15  }
 0xbae PF: > { %p5235_p1 = scmp.ge.s32.totalorder %s5844_s16, 2  ;;  %s4449_s17 = sand.u32 1, %s5832_s29  }
 0xbaf   : > { %s4450_s26 = scalar_lea.sflag [#allocation3], %s4449_s17 }
 0xbb0   : > { %p5232_p2 = pnand %p5235_p1, %p5966_p6 }
 0xbb2   : > { %5827 = dma.done.wait (!%p5232_p2), %s4450_s26, 16  }
 0xbb3   : > { %5829 = vsyncadd (!%p5232_p2), %s4450_s26, 4294967280  ;;  %s7390_s16 = sld [smem:[#allocation6_spill]]  ;;  %s7391_s27 = sld [smem:[#allocation5_spill]] }
 0xbb4   : > { %s7392_s15 = sld [smem:[#allocation7_spill]]  ;;  %s7393_s29 = smov %s5836_s30 }
 0xbb9   : > { %p24_p3 = scmp.ge.s32.totalorder %s7390_s16, 4   ;;  %s7394_s30 = smov %s7391_s27 }
 0xbbb   :  { %26 = sbr.rel (!%p24_p3) target bundleno = 5 (0x5), region = 135 }
 0xbc2   :  { %4454 = vsyncpa [#allocation3], 1 }
 0xbc3   :  { %4456 = vsyncpa [#allocation3 + $0x1], 1 }

</bundles_post_ra>
